<compile_context>
chip_gen: v7x
topology: tpu7x:2x2x1
jax: 0.10.0
libtpu: 0.0.40
codegen_flags: <defaults>
</compile_context>

<pallas_src>
import numpy as np
import jax
import jax.numpy as jnp
from jax import lax
from jax.experimental import pallas as pl
from jax.experimental.pallas import tpu as pltpu


# ---------------------------------------------------------------------------
# Pallas kernels
# ---------------------------------------------------------------------------
def _dist_kernel_single_k(tri_i_ref, tri_j_ref, xr_ref, xc_ref,
                          sqr_ref, sqc_ref, dist_ref):
    """d fits in one K slab: no accumulator, no pl.when — dot + epilogue."""
    gram = lax.dot_general(
        xr_ref[...], xc_ref[...],
        dimension_numbers=(((1,), (1,)), ((), ())),   # contract lane dims, no transpose
        preferred_element_type=jnp.float32)
    d2 = sqr_ref[...] + sqc_ref[...] - 2.0 * gram
    dist_ref[...] = jnp.sqrt(jnp.maximum(d2, 1e-12))  # clamp(min=1e-12).sqrt()


def _dist_kernel_multi_k(tri_i_ref, tri_j_ref, xr_ref, xc_ref,
                         sqr_ref, sqc_ref, dist_ref, acc_ref):
    """General path: K-slab accumulation in a f32 VMEM scratch."""
    k = pl.program_id(1)

    gram = lax.dot_general(
        xr_ref[...], xc_ref[...],
        dimension_numbers=(((1,), (1,)), ((), ())),
        preferred_element_type=jnp.float32)

    @pl.when(k == 0)
    def _():
        acc_ref[...] = gram            # first slab: store (saves zero-init + add)

    @pl.when(k > 0)
    def _():
        acc_ref[...] += gram

    @pl.when(k == pl.num_programs(1) - 1)
    def _():
        d2 = sqr_ref[...] + sqc_ref[...] - 2.0 * acc_ref[...]
        dist_ref[...] = jnp.sqrt(jnp.maximum(d2, 1e-12))


# ---------------------------------------------------------------------------
# Wrapper
# ---------------------------------------------------------------------------
def pairwise_dist(x, *, tile=256, tk=256, mxu_dtype=jnp.float32):
    """n x n Euclidean distance matrix via a tiled, symmetry-aware Pallas kernel.

    tile: square (rows x cols) output tile, multiple of 128.  256 is MXU-native
          on v6e/v7x; on v5e keep tk=128 if sweeping.
    mxu_dtype: dtype of the matmul operands.  bfloat16 halves input DMA and
          gives ~3x MXU throughput but perturbs distances by ~1e-3-scale
          (can flip hard-negative argsort in rare ties); default keeps f32 for
          parity with the PyTorch reference.
    """
    assert tile % 128 == 0 and tk % 128 == 0
    x = jnp.asarray(x, jnp.float32)
    n, d = x.shape

    # Single square tile size -> one round-up keeps the grid exactly divisible.
    n_pad = pl.cdiv(n, tile) * tile
    d_pad128 = pl.cdiv(d, 128) * 128          # lane-align K
    if d_pad128 <= tk:
        tk_eff, d_pad = d_pad128, d_pad128    # whole K in one slab
    else:
        tk_eff = tk
        d_pad = pl.cdiv(d, tk) * tk

    # Pad only when needed (avoid an extra full copy for aligned inputs).
    if n_pad == n and d_pad == d:
        xp = x
    else:
        xp = jnp.zeros((n_pad, d_pad), jnp.float32).at[:n, :d].set(x)

    # Per-row squared norms: computed once in f32, streamed as tiny side inputs.
    sq = jnp.sum(xp * xp, axis=1, keepdims=True)       # (n_pad, 1)
    sq_row = sq
    sq_col = sq.reshape(1, n_pad)

    x_mxu = xp.astype(mxu_dtype)

    # Upper-triangular block pairs (j >= i), flattened; fed via scalar prefetch.
    nb = n_pad // tile
    ti_np, tj_np = np.triu_indices(nb)
    tri_i = jnp.asarray(ti_np, dtype=jnp.int32)
    tri_j = jnp.asarray(tj_np, dtype=jnp.int32)
    num_tiles = int(tri_i.shape[0])

    out_shape = jax.ShapeDtypeStruct((n_pad, n_pad), jnp.float32)
    vmem_limit = 32 * 1024 * 1024   # comfortably fits these tiles on v5e/v6e/v7x

    if d_pad == tk_eff:
        # ---- single-K fast path: 1-D grid, no scratch, no pl.when ----
        dist_up = pl.pallas_call(
            _dist_kernel_single_k,
            out_shape=out_shape,
            grid_spec=pltpu.PrefetchScalarGridSpec(
                num_scalar_prefetch=2,
                grid=(num_tiles,),
                in_specs=[
                    pl.BlockSpec((tile, tk_eff), lambda t, ti, tj: (ti[t], 0)),
                    pl.BlockSpec((tile, tk_eff), lambda t, ti, tj: (tj[t], 0)),
                    pl.BlockSpec((tile, 1), lambda t, ti, tj: (ti[t], 0)),
                    pl.BlockSpec((1, tile), lambda t, ti, tj: (0, tj[t])),
                ],
                out_specs=pl.BlockSpec((tile, tile),
                                       lambda t, ti, tj: (ti[t], tj[t])),
            ),
            compiler_params=pltpu.CompilerParams(
                dimension_semantics=("parallel",),
                vmem_limit_bytes=vmem_limit),
        )(tri_i, tri_j, x_mxu, x_mxu, sq_row, sq_col)
    else:
        # ---- multi-K path: accumulate over K slabs in a VMEM scratch ----
        grid = (num_tiles, d_pad // tk_eff)
        dist_up = pl.pallas_call(
            _dist_kernel_multi_k,
            out_shape=out_shape,
            grid_spec=pltpu.PrefetchScalarGridSpec(
                num_scalar_prefetch=2,
                grid=grid,
                in_specs=[
                    pl.BlockSpec((tile, tk_eff), lambda t, k, ti, tj: (ti[t], k)),
                    pl.BlockSpec((tile, tk_eff), lambda t, k, ti, tj: (tj[t], k)),
                    pl.BlockSpec((tile, 1), lambda t, k, ti, tj: (ti[t], 0)),
                    pl.BlockSpec((1, tile), lambda t, k, ti, tj: (0, tj[t])),
                ],
                out_specs=pl.BlockSpec((tile, tile),
                                       lambda t, k, ti, tj: (ti[t], tj[t])),
                scratch_shapes=[pltpu.VMEM((tile, tile), jnp.float32)],
            ),
            compiler_params=pltpu.CompilerParams(
                dimension_semantics=("parallel", "arbitrary"),
                vmem_limit_bytes=vmem_limit),
        )(tri_i, tri_j, x_mxu, x_mxu, sq_row, sq_col)

    # Mirror the (never-written) lower triangle from the computed upper one.
    ar = jnp.arange(n_pad)
    upper_mask = ar[:, None] <= ar[None, :]
    dist_full = jnp.where(upper_mask, dist_up, dist_up.T)

    if n_pad != n:
        dist_full = dist_full[:n, :n]
    return dist_full


# ---------------------------------------------------------------------------
# Host-side mining loop (mirrors RobustTripletLoss_DART.forward exactly)
# ---------------------------------------------------------------------------
def robust_triplet_loss_dart(inputs, prediction, targets, true_targets, prob,
                             threshold, margin, seed=0):
    """Mirrors RobustTripletLoss_DART.forward. Returns (loss, correct, cnt)."""
    del true_targets  # unused by the reference forward pass as well

    # --- Pallas hot path: pairwise distance matrix (f32 for reference parity) ---
    dist = np.asarray(jax.block_until_ready(pairwise_dist(inputs)))

    prediction = np.asarray(prediction)
    targets = np.asarray(targets)
    prob = np.asarray(prob)
    n = dist.shape[0]

    is_pos = targets[:, None] == targets[None, :]
    is_neg = ~is_pos
    is_confident = prob >= threshold

    # TODO(synk): the mining loop below (random positive sampling, argsort-based
    # hard negative mining, nested data-dependent re-sampling branches) is
    # inherently sequential host control flow and is kept in NumPy.
    rng = np.random.RandomState(seed)
    dist_ap, dist_an = [], []
    cnt, loss = 0, 0.0
    loss_inverse = False
    for i in range(n):
        if not is_confident[i]:
            continue
        pos_idx = np.nonzero(is_pos[i])[0]
        neg_idx = np.nonzero(is_neg[i])[0]

        random_pos_index = int(rng.choice(pos_idx, 1)[0])
        while random_pos_index == i:
            random_pos_index = int(rng.choice(pos_idx, 1)[0])

        rank_neg_index = np.argsort(dist[i][neg_idx])
        hard_neg_index = int(neg_idx[rank_neg_index[0]])

        dist_ap.append(float(dist[i][random_pos_index]))
        dist_an.append(float(dist[i][hard_neg_index]))

        if prob[random_pos_index] >= threshold and prob[hard_neg_index] >= threshold:
            pass
        elif prob[random_pos_index] >= threshold and prob[hard_neg_index] < threshold:
            is_FN = int(np.argmax(prediction[hard_neg_index])) == int(targets[i])
            if is_FN:
                j = 1
                tmp = rank_neg_index[1]
                hard_neg_index_new = int(neg_idx[tmp])
                loop_cnt = 0
                while prob[hard_neg_index_new] < threshold:
                    j += 1
                    tmp = rank_neg_index[j]
                    hard_neg_index_new = int(neg_idx[tmp])
                    loop_cnt += 1
                    if loop_cnt >= 10:
                        break
                dist_ap[cnt] = (dist[i][random_pos_index] + dist[i][hard_neg_index]) / 2.0
                dist_an[cnt] = float(dist[i][hard_neg_index_new])
            else:
                pass
        elif prob[random_pos_index] < threshold and prob[hard_neg_index] >= threshold:
            random_pos_index_new = int(rng.choice(pos_idx, 1)[0])
            loop_cnt = 0
            while random_pos_index_new == i or prob[random_pos_index_new] < threshold:
                random_pos_index_new = int(rng.choice(pos_idx, 1)[0])
                loop_cnt += 1
                if loop_cnt >= 5:
                    break
            dist_an[cnt] = (dist[i][random_pos_index] + dist[i][hard_neg_index]) / 2.0
            dist_ap[cnt] = float(dist[i][random_pos_index_new])
        else:  # both below threshold
            is_FN = int(np.argmax(prediction[hard_neg_index])) == int(targets[i])
            if is_FN:
                loss_inverse = True
            else:
                random_pos_index_new = int(rng.choice(pos_idx, 1)[0])
                loop_cnt = 0
                while random_pos_index_new == i or prob[random_pos_index_new] < threshold:
                    random_pos_index_new = int(rng.choice(pos_idx, 1)[0])
                    loop_cnt += 1
                    if loop_cnt >= 5:
                        break
                dist_an[cnt] = (dist[i][random_pos_index] + dist[i][hard_neg_index]) / 2.0
                dist_ap[cnt] = float(dist[i][random_pos_index_new])

        if loss_inverse:
            loss += max(dist_an[cnt] - dist_ap[cnt] + margin, 0.0)
        else:
            loss += max(dist_ap[cnt] - dist_an[cnt] + margin, 0.0)
        cnt += 1
        loss_inverse = False

    if cnt == 0:
        return np.float32(0.0), 0, cnt
    dist_ap = np.asarray(dist_ap, dtype=np.float32)
    dist_an = np.asarray(dist_an, dtype=np.float32)
    correct = int(np.sum(dist_an >= dist_ap))
    return np.float32(loss / cnt), correct, cnt


# ---------------------------------------------------------------------------
# Demo / self-check
# ---------------------------------------------------------------------------
def _check_dist(dist, x_np, rtol, atol):
    """Sanity check vs a NumPy reference.

    Off-diagonal entries use a tolerance loose enough for MXU f32/bf16
    rounding.  Diagonal entries are ~sqrt(clamp(~0, 1e-12)) on both sides and
    are extremely rounding-sensitive after the sqrt, so they are only required
    to be tiny relative to typical distances (this is what broke the previous
    version's overly tight allclose).
    """
    n = x_np.shape[0]
    sq = np.sum(x_np * x_np, axis=1, keepdims=True)
    ref = np.sqrt(np.maximum(sq + sq.T - 2.0 * (x_np @ x_np.T), 1e-12))
    assert dist.shape == (n, n)
    assert np.all(np.isfinite(dist))
    off = ~np.eye(n, dtype=bool)
    assert np.allclose(dist[off], ref[off], rtol=rtol, atol=atol)
    assert np.all(np.diag(dist) <= 0.25 * ref[off].mean() + 1e-3)


if __name__ == "__main__":
    batch, feat, num_classes = 8, 32, 4
    margin, threshold = 0.3, 0.5

    key = jax.random.PRNGKey(0)
    k_in, k_pred, k_big = jax.random.split(key, 3)

    inputs = jax.random.normal(k_in, (batch, feat), dtype=jnp.float32)
    prediction = jax.random.normal(k_pred, (batch, num_classes), dtype=jnp.float32)
    targets = jnp.array([0, 0, 0, 0, 1, 1, 1, 1], dtype=jnp.int32)
    true_targets = targets
    # one low-confidence sample (index 4) to exercise the robust re-mining branches
    prob = jnp.array([0.9, 0.8, 0.95, 0.7, 0.4, 0.9, 0.85, 0.9], dtype=jnp.float32)

    x_np = np.asarray(inputs, dtype=np.float32)

    # 1) f32 operands, single-K-slab fast path (d=32 -> one 128-wide slab).
    dist_f32 = np.asarray(jax.block_until_ready(pairwise_dist(inputs)))
    _check_dist(dist_f32, x_np, rtol=2e-2, atol=5e-2)

    # 2) bf16 MXU operands (halved input DMA, ~3x MXU throughput); epilogue f32.
    dist_bf16 = np.asarray(jax.block_until_ready(
        pairwise_dist(inputs, mxu_dtype=jnp.bfloat16)))
    _check_dist(dist_bf16, x_np, rtol=3e-2, atol=1e-1)

    # 3) multi-K accumulator path (d=512 -> two 256-wide K slabs).
    big = jax.random.normal(k_big, (batch, 512), dtype=jnp.float32)
    dist_big = np.asarray(jax.block_until_ready(pairwise_dist(big)))
    _check_dist(dist_big, np.asarray(big, np.float32), rtol=2e-2, atol=2e-1)

    # Full forward pass (f32 distances for parity with the PyTorch reference).
    loss, correct, cnt = robust_triplet_loss_dart(
        inputs, prediction, targets, true_targets, prob, threshold, margin, seed=0)
    assert np.isfinite(float(loss)) and cnt > 0

    print("KERNEL_OK")
</pallas_src>

<mosaic_0001>
module attributes {stable_mosaic.version = 11 : i64} {
  func.func @_dist_kernel_single_k(%arg0: i32, %arg1: memref<1xi32, #tpu.memory_space<smem>>, %arg2: memref<1xi32, #tpu.memory_space<smem>>, %arg3: memref<256x128xf32, #tpu.memory_space<vmem>>, %arg4: memref<256x128xf32, #tpu.memory_space<vmem>>, %arg5: memref<256x1xf32, #tpu.memory_space<vmem>>, %arg6: memref<1x256xf32, #tpu.memory_space<vmem>>, %arg7: memref<256x256xf32, #tpu.memory_space<vmem>>) attributes {dimension_semantics = [#tpu.dimension_semantics<parallel>], iteration_bounds = array<i64: 1>, scalar_prefetch = 2 : i64, scratch_operands = 0 : i64, tpu.core_type = #tpu.core_type<tc>, window_params = [{transform_indices = @transform_0, window_bounds = array<i64: 256, 128>}, {transform_indices = @transform_1, window_bounds = array<i64: 256, 128>}, {transform_indices = @transform_2, window_bounds = array<i64: 256, 1>}, {transform_indices = @transform_3, window_bounds = array<i64: 1, 256>}, {transform_indices = @transform_4, window_bounds = array<i64: 256, 256>}]} {
    %c0 = arith.constant 0 : index
    %c0_0 = arith.constant 0 : index
    %0 = vector.load %arg3[%c0, %c0_0] : memref<256x128xf32, #tpu.memory_space<vmem>>, vector<256x128xf32>
    %c0_1 = arith.constant 0 : index
    %c0_2 = arith.constant 0 : index
    %1 = vector.load %arg4[%c0_1, %c0_2] : memref<256x128xf32, #tpu.memory_space<vmem>>, vector<256x128xf32>
    %cst = arith.constant dense<0.000000e+00> : vector<256x256xf32>
    %2 = tpu.matmul %0, %1, %cst {dimension_numbers = #tpu.dot_dimension_numbers<[1], [1], [0], [0], [0, 0, 1, 0], [], []>} : vector<256x128xf32>, vector<256x128xf32>, vector<256x256xf32> -> vector<256x256xf32>
    %c0_3 = arith.constant 0 : index
    %c0_4 = arith.constant 0 : index
    %3 = vector.load %arg5[%c0_3, %c0_4] : memref<256x1xf32, #tpu.memory_space<vmem>>, vector<256x1xf32>
    %c0_5 = arith.constant 0 : index
    %c0_6 = arith.constant 0 : index
    %4 = vector.load %arg6[%c0_5, %c0_6] : memref<1x256xf32, #tpu.memory_space<vmem>>, vector<1x256xf32>
    %5 = vector.broadcast %3 : vector<256x1xf32> to vector<256x256xf32>
    %6 = vector.broadcast %4 : vector<1x256xf32> to vector<256x256xf32>
    %7 = arith.addf %5, %6 : vector<256x256xf32>
    %cst_7 = arith.constant 2.000000e+00 : f32
    %8 = vector.broadcast %cst_7 : f32 to vector<256x256xf32>
    %9 = arith.mulf %8, %2 : vector<256x256xf32>
    %10 = arith.subf %7, %9 : vector<256x256xf32>
    %cst_8 = arith.constant 9.99999996E-13 : f32
    %11 = vector.broadcast %cst_8 : f32 to vector<256x256xf32>
    %12 = arith.maximumf %10, %11 : vector<256x256xf32>
    %13 = math.sqrt %12 : vector<256x256xf32>
    %c0_9 = arith.constant 0 : index
    %c0_10 = arith.constant 0 : index
    %14 = vector.load %arg7[%c0_9, %c0_10] : memref<256x256xf32, #tpu.memory_space<vmem>>, vector<256x256xf32>
    tpu.vector_store %arg7[%c0_9, %c0_10], %13 {strides = array<i32>} : memref<256x256xf32, #tpu.memory_space<vmem>>, vector<256x256xf32>,
    return
  }
  func.func @transform_0(%arg0: i32, %arg1: memref<1xi32, #tpu.memory_space<smem>>, %arg2: memref<1xi32, #tpu.memory_space<smem>>) -> (i32, i32) {
    %0 = arith.index_cast %arg0 : i32 to index
    %1 = memref.load %arg1[%0] : memref<1xi32, #tpu.memory_space<smem>>
    %c0_i32 = arith.constant 0 : i32
    %c0_i32_0 = arith.constant 0 : i32
    return %1, %c0_i32 : i32, i32
  }
  func.func @transform_1(%arg0: i32, %arg1: memref<1xi32, #tpu.memory_space<smem>>, %arg2: memref<1xi32, #tpu.memory_space<smem>>) -> (i32, i32) {
    %0 = arith.index_cast %arg0 : i32 to index
    %1 = memref.load %arg2[%0] : memref<1xi32, #tpu.memory_space<smem>>
    %c0_i32 = arith.constant 0 : i32
    %c0_i32_0 = arith.constant 0 : i32
    return %1, %c0_i32 : i32, i32
  }
  func.func @transform_2(%arg0: i32, %arg1: memref<1xi32, #tpu.memory_space<smem>>, %arg2: memref<1xi32, #tpu.memory_space<smem>>) -> (i32, i32) {
    %0 = arith.index_cast %arg0 : i32 to index
    %1 = memref.load %arg1[%0] : memref<1xi32, #tpu.memory_space<smem>>
    %c0_i32 = arith.constant 0 : i32
    %c0_i32_0 = arith.constant 0 : i32
    return %1, %c0_i32 : i32, i32
  }
  func.func @transform_3(%arg0: i32, %arg1: memref<1xi32, #tpu.memory_space<smem>>, %arg2: memref<1xi32, #tpu.memory_space<smem>>) -> (i32, i32) {
    %0 = arith.index_cast %arg0 : i32 to index
    %1 = memref.load %arg2[%0] : memref<1xi32, #tpu.memory_space<smem>>
    %c0_i32 = arith.constant 0 : i32
    %c0_i32_0 = arith.constant 0 : i32
    return %c0_i32, %1 : i32, i32
  }
  func.func @transform_4(%arg0: i32, %arg1: memref<1xi32, #tpu.memory_space<smem>>, %arg2: memref<1xi32, #tpu.memory_space<smem>>) -> (i32, i32) {
    %0 = arith.index_cast %arg0 : i32 to index
    %1 = memref.load %arg1[%0] : memref<1xi32, #tpu.memory_space<smem>>
    %2 = arith.index_cast %arg0 : i32 to index
    %3 = memref.load %arg2[%2] : memref<1xi32, #tpu.memory_space<smem>>
    %c0_i32 = arith.constant 0 : i32
    return %1, %3 : i32, i32
  }
}

</mosaic_0001>

<bundles_post_ra>
// kernel: tpu_custom_call.1
= control target key start
LH: loop header
LB: loop body
LE: loop exit
PB: predicated region body
PF: predicated region fallthrough
CT: control target
= control target key end

     0   :  { %13 = vsyncpa [#allocation6], 0  ;;  %s3010_s0 = inlined_call_operand.<no memory space> [shape: s32[1], index: 0, kind: input, shape index: {}]   ;;  %s3011_s1 = inlined_call_operand.<no memory space> [shape: s32[1], index: 1, kind: input, shape index: {}]   ;;  %s3012_s2 = inlined_call_operand.vmem [shape: f32[256,128], index: 2, kind: input, shape index: {}]   ;;  %s3013_s3 = inlined_call_operand.hbm [shape: f32[256,128], index: 3, kind: input, shape index: {}]   ;;  %s3014_s4 = inlined_call_operand.vmem [shape: f32[256,1], index: 4, kind: input, shape index: {}]   ;;  %s3015_s5 = inlined_call_operand.vmem [shape: f32[1,256], index: 5, kind: input, shape index: {}]   ;;  %s3016_s6 = inlined_call_operand.hbm [shape: f32[256,256], index: 6, kind: output, shape index: {}]  }
   0x1   :  { %14 = vsyncpa [#allocation7], 0  ;;  %s1460_s23 = sshll.u32 %s3011_s1, 12  ;;  %s1795_s27 = smov [#allocation5]  }
   0x2   :  { %s33_s26 = scalar_lea.hbm %s3013_s3, %s1460_s23  ;;  %s34_s28 = sshll.u32 %s1795_s27, 4  ;;  %s35_s28 = int_to_ptr.vmem [resolvable:$true] %s34_s28 }
   0x3   :  { %s1743_s29 = scalar_lea.hbm %s33_s26, 4096  ;;  %s1745_s8 = scalar_lea.hbm %s3013_s3, 4096 }
   0x4   :  { %p1744_p0 = scmp.ne.s32.totalorder %s33_s26, %s1743_s29  ;;  %p1746_p1 = scmp.lt.u32.totalorder %s33_s26, %s3013_s3 }
   0x5   :  { %p1747_p2 = scmp.lt.u32.totalorder %s1745_s8, %s1743_s29  ;;  %p1749_p4 = scmp.lt.u32.totalorder %s1743_s29, %s33_s26 }
   0x7   :  { %p1748_p3 = por %p1747_p2, %p1746_p1 }
   0x9   :  { %p1750_p5 = por %p1749_p4, %p1748_p3 }
   0xb   :  { %p1751_p6 = pnand %p1750_p5, %p1744_p0 }
   0xd   :  { %1754 = shalt.err (!%p1751_p6)
}
   0xe   :  { %s1755_s11 = scalar_lea.vmem %s35_s28, 4096  ;;  %p1760_p8 = scmp.lt.s32.totalorder %s35_s28, %s35_s28 }
   0xf   :  { %p1756_p7 = scmp.ne.s32.totalorder %s35_s28, %s1755_s11  ;;  %p1761_p9 = scmp.lt.s32.totalorder %s1755_s11, %s1755_s11 }
  0x11   :  { %p1762_p10 = por %p1761_p9, %p1760_p8 }
  0x13   :  { %p1763_p11 = pnand %p1762_p10, %p1756_p7 }
  0x15   :  { %1766 = shalt.err (!%p1763_p11)
}
  0x16   :  { %s1796_s12 = smov 128   ;;  %s1797_s13 = smov 8  }
  0x17   :  { %40 = dma.hbm_to_vmem [thread:$0]  %s33_s26, 4096, %s35_s28, [#allocation6], %s1796_s12, %s1796_s12, %s1797_s13  }
  0x18   :  { %1791 = dma.done.wait [#allocation6], 4096  }
  0x19   :  { %1792 = vsyncadd [#allocation6], 4294963200  ;;  %s1451_s15 = sshll.u32 %s3010_s0, 5  ;;  %v1798_v0 = vmov 0   ;;  %v157_v1 = vld [vmem:[#allocation5 + $0x80] sm:$0xff]  ;;  %v158_v2 = vld [vmem:[#allocation5 + $0x88] sm:$0xff] }
  0x1a   :  { %1614 = vset.pattern.permute.xlu1 %v1798_v0  ;;  %1613 = vset.pattern.permute.xlu0 %v1798_v0  ;;  %p82_p12 = scmp.lt.s32.totalorder %s1451_s15, 31  ;;  %v141_v3 = vld [vmem:[#allocation5] sm:$0xff]  ;;  %v1558_v4 = vpack.c.bf16 %v158_v2, %v157_v1  ;;  %v142_v5 = vld [vmem:[#allocation5 + $0x8] sm:$0xff]  ;;  %v159_v6 = vld [vmem:[#allocation5 + $0x90] sm:$0xff]  ;;  %s1937_s23 = sshll.u32 %s3011_s1, 1 }
  0x1b   :  { %v160_v7 = vld [vmem:[#allocation5 + $0x98] sm:$0xff]  ;;  %v1560_v8 = vpack.c.bf16 %v142_v5, %v141_v3  ;;  %v143_v10 = vld [vmem:[#allocation5 + $0x10] sm:$0xff]  ;;  %v161_v12 = vld [vmem:[#allocation5 + $0xa0] sm:$0xff]  ;;  %p100_p13 = scmp.lt.s32.totalorder %s1937_s23, 1  ;;  %s1461_s28 = sshll.u32 %s3010_s0, 6 }
  0x1c   :  { %s3084_s15 = smov (!%p82_p12, %s1451_s15), 31  ;;  %v1562_v9 = vpack.c.bf16 %v160_v7, %v159_v6  ;;  %1559 = vmatprep.subr.bf16.mxu0 %v1558_v4  ;;  %1590 = vmatprep.subr.bf16.mxu1 %v1558_v4  ;;  %v144_v11 = vld [vmem:[#allocation5 + $0x18] sm:$0xff]  ;;  %v162_v13 = vld [vmem:[#allocation5 + $0xa8] sm:$0xff]  ;;  %v145_v18 = vld [vmem:[#allocation5 + $0x20] sm:$0xff]  ;;  %s2988_s29 = sadd.s32 %s1461_s28, %s1937_s23 }
  0x1d   :  { %1561 = vmatpush3.bf16.xpose.msra.mxu0 %v1560_v8  ;;  %1598 = vmatpush3.bf16.xpose.msra.mxu1 %v1560_v8  ;;  %s1452_s16 = sshll.u32 %s3084_s15, 3  ;;  %v1564_v14 = vpack.c.bf16 %v144_v11, %v143_v10  ;;  %v1566_v15 = vpack.c.bf16 %v162_v13, %v161_v12  ;;  %v146_v19 = vld [vmem:[#allocation5 + $0x28] sm:$0xff]  ;;  %v163_v20 = vld [vmem:[#allocation5 + $0xb0] sm:$0xff]  ;;  %v164_v21 = vld [vmem:[#allocation5 + $0xb8] sm:$0xff]  ;;  %s1459_s0 = sshll.u32 %s2988_s29, 7 }
  0x1e   :  { %1563 = vmatprep.subr.bf16.mxu0 %v1562_v9  ;;  %1591 = vmatprep.subr.bf16.mxu1 %v1562_v9  ;;  %s1855_s19 = scalar_lea.vmem %s3012_s2, %s1452_s16  ;;  %s1867_s22 = scalar_lea.vmem %s3014_s4, %s1452_s16  ;;  %v1568_v24 = vpack.c.bf16 %v146_v19, %v145_v18  ;;  %v1570_v25 = vpack.c.bf16 %v164_v21, %v163_v20  ;;  %v147_v28 = vld [vmem:[#allocation5 + $0x30] sm:$0xff]  ;;  %v148_v29 = vld [vmem:[#allocation5 + $0x38] sm:$0xff]  ;;  %v165_v30 = vld [vmem:[#allocation5 + $0xc0] sm:$0xff] }
  0x1f   :  { %v1858_v16 = vld [vmem:[%s1855_s19] sm:$0xff]  ;;  %v432_v22 = vld [vmem:[%s1867_s22 + $0x10] sm:$0xff]  ;;  %v433_v26 = vld [vmem:[%s1867_s22 + $0x18] sm:$0xff]  ;;  %v1572_v34 = vpack.c.bf16 %v148_v29, %v147_v28  ;;  %s101_s24 = scalar_select %p100_p13, %s1937_s23, 1 }
  0x20   :  { %1494 = vmatprep.mubr.f32.mxu0 %v1858_v16  ;;  %v1862_v17 = vld [vmem:[%s1855_s19 + $0x80] sm:$0xff]  ;;  %475 = vperm.xlu1 %1614, %v432_v22   ;;  %v431_v27 = vld [vmem:[%s1867_s22 + $0x8] sm:$0xff]  ;;  %v437_v36 = vld [vmem:[%s1867_s22 + $0x38] sm:$0xff]  ;;  %s1799_s30 = smov [#allocation8]   ;;  %s1414_s10 = scalar_lea.hbm %s3016_s6, %s1459_s0 }
  0x21   :  { %1526 = vmatprep.mubr.f32.mxu1 %v1862_v17  ;;  %v430_v23 = vld [vmem:[%s1867_s22] sm:$0xff]  ;;  %v166_v31 = vld [vmem:[#allocation5 + $0xc8] sm:$0xff]  ;;  %v436_v37 = vld [vmem:[%s1867_s22 + $0x30] sm:$0xff]  ;;  %s102_s27 = scalar_lea.vmem %s3015_s5, %s101_s24  ;;  %s1415_s7 = sshll.u32 %s1799_s30, 4  ;;  %s1416_s7 = int_to_ptr.vmem [resolvable:$true] %s1415_s7 }
  0x22   :  { %465 = vperm.xlu0 %1613, %v430_v23   ;;  %v435_v32 = vld [vmem:[%s1867_s22 + $0x28] sm:$0xff]  ;;  %v434_v33 = vld [vmem:[%s1867_s22 + $0x20] sm:$0xff]  ;;  %v1574_v35 = vpack.c.bf16 %v166_v31, %v165_v30  ;;  %v167_v40 = vld [vmem:[#allocation5 + $0xd0] sm:$0xff]  ;;  %s1767_s11 = scalar_lea.vmem %s1416_s7, 8192  ;;  %p1772_p1 = scmp.lt.s32.totalorder %s1416_s7, %s1416_s7 }
  0x23   :  { %v149_v38 = vld [vmem:[#allocation5 + $0x40] sm:$0xff]  ;;  %v150_v39 = vld [vmem:[#allocation5 + $0x48] sm:$0xff]  ;;  %v168_v41 = vld [vmem:[#allocation5 + $0xd8] sm:$0xff]  ;;  %p1768_p0 = scmp.ne.s32.totalorder %s1416_s7, %s1767_s11  ;;  %p1773_p2 = scmp.lt.s32.totalorder %s1767_s11, %s1767_s11 }
  0x24   :  { %480 = vperm.xlu1 %1614, %v433_v26   ;;  %v439_v42 = vld [vmem:[%s1867_s22 + $0x48] sm:$0xff]  ;;  %v438_v43 = vld [vmem:[%s1867_s22 + $0x40] sm:$0xff]  ;;  %v1576_v44 = vpack.c.bf16 %v150_v39, %v149_v38  ;;  %v1578_v45 = vpack.c.bf16 %v168_v41, %v167_v40  ;;  %v441_v46 = vld [vmem:[%s1867_s22 + $0x58] sm:$0xff] }
  0x25   :  { %1565 = vmatpush3.bf16.xpose.msra.mxu0 %v1564_v14  ;;  %1599 = vmatpush3.bf16.xpose.msra.mxu1 %v1564_v14  ;;  %v440_v47 = vld [vmem:[%s1867_s22 + $0x50] sm:$0xff]  ;;  %v152_v49 = vld [vmem:[#allocation5 + $0x58] sm:$0xff]  ;;  %v169_v50 = vld [vmem:[#allocation5 + $0xe0] sm:$0xff]  ;;  %p1774_p3 = por %p1773_p2, %p1772_p1 }
  0x26   :  { %1567 = vmatprep.subr.bf16.mxu0 %v1566_v15  ;;  %1592 = vmatprep.subr.bf16.mxu1 %v1566_v15  ;;  %v151_v48 = vld [vmem:[#allocation5 + $0x50] sm:$0xff]  ;;  %v170_v51 = vld [vmem:[#allocation5 + $0xe8] sm:$0xff]  ;;  %v442_v53 = vld [vmem:[%s1867_s22 + $0x60] sm:$0xff] }
  0x27   :  { %470 = vperm.xlu0 %1613, %v431_v27   ;;  %v443_v52 = vld [vmem:[%s1867_s22 + $0x68] sm:$0xff]  ;;  %v1580_v54 = vpack.c.bf16 %v152_v49, %v151_v48  ;;  %v1582_v55 = vpack.c.bf16 %v170_v51, %v169_v50  ;;  %v445_v56 = vld [vmem:[%s1867_s22 + $0x78] sm:$0xff]  ;;  %v444_v57 = vld [vmem:[%s1867_s22 + $0x70] sm:$0xff]  ;;  %v624_v49 = vlaneseq  ;;  %p1775_p4 = pnand %p1774_p3, %p1768_p0 }
  0x28   :  { %490 = vperm.xlu1 %1614, %v435_v32   ;;  %v153_v58 = vld [vmem:[#allocation5 + $0x60] sm:$0xff]  ;;  %v154_v59 = vld [vmem:[#allocation5 + $0x68] sm:$0xff]  ;;  %v171_v60 = vld [vmem:[#allocation5 + $0xf0] sm:$0xff] }
  0x29   :  { %v172_v61 = vld [vmem:[#allocation5 + $0xf8] sm:$0xff]  ;;  %v447_v62 = vld [vmem:[%s1867_s22 + $0x88] sm:$0xff]  ;;  %v446_v63 = vld [vmem:[%s1867_s22 + $0x80] sm:$0xff]  ;;  %v1584_v0 = vpack.c.bf16 %v154_v59, %v153_v58 }
  0x2a   :  { %v1586_v1 = vpack.c.bf16 %v172_v61, %v171_v60  ;;  %v449_v2 = vld [vmem:[%s1867_s22 + $0x98] sm:$0xff]  ;;  %v448_v3 = vld [vmem:[%s1867_s22 + $0x90] sm:$0xff]  ;;  %v451_v6 = vld [vmem:[%s1867_s22 + $0xa8] sm:$0xff] }
  0x2b   :  { %485 = vperm.xlu0 %1613, %v434_v33   ;;  %v155_v4 = vld [vmem:[#allocation5 + $0x70] sm:$0xff]  ;;  %v156_v5 = vld [vmem:[#allocation5 + $0x78] sm:$0xff]  ;;  %v450_v7 = vld [vmem:[%s1867_s22 + $0xa0] sm:$0xff] }
  0x2c   :  { %500 = vperm.xlu1 %1614, %v437_v36   ;;  %v1588_v8 = vpack.c.bf16 %v156_v5, %v155_v4  ;;  %v453_v9 = vld [vmem:[%s1867_s22 + $0xb8] sm:$0xff]  ;;  %v452_v10 = vld [vmem:[%s1867_s22 + $0xb0] sm:$0xff]  ;;  %v455_v11 = vld [vmem:[%s1867_s22 + $0xc8] sm:$0xff] }
  0x2d   :  { %1569 = vmatpush3.bf16.xpose.msra.mxu0 %v1568_v24  ;;  %1600 = vmatpush3.bf16.xpose.msra.mxu1 %v1568_v24  ;;  %v454_v12 = vld [vmem:[%s1867_s22 + $0xc0] sm:$0xff]  ;;  %v110_v13 = vld [vmem:[%s1855_s19 + $0x8] sm:$0xff]  ;;  %v457_v15 = vld [vmem:[%s1867_s22 + $0xd8] sm:$0xff] }
  0x2e   :  { %1571 = vmatprep.subr.bf16.mxu0 %v1570_v25  ;;  %1593 = vmatprep.subr.bf16.mxu1 %v1570_v25  ;;  %v126_v14 = vld [vmem:[%s1855_s19 + $0x88] sm:$0xff]  ;;  %v456_v18 = vld [vmem:[%s1867_s22 + $0xd0] sm:$0xff]  ;;  %v128_v22 = vld [vmem:[%s1855_s19 + $0x98] sm:$0xff] }
  0x2f   :  { %495 = vperm.xlu0 %1613, %v436_v37   ;;  %v111_v19 = vld [vmem:[%s1855_s19 + $0x10] sm:$0xff]  ;;  %v459_v21 = vld [vmem:[%s1867_s22 + $0xe8] sm:$0xff]  ;;  %v461_v23 = vld [vmem:[%s1867_s22 + $0xf8] sm:$0xff] }
  0x30   :  { %510 = vperm.xlu1 %1614, %v439_v42   ;;  %v127_v20 = vld [vmem:[%s1855_s19 + $0x90] sm:$0xff]  ;;  %v113_v25 = vld [vmem:[%s1855_s19 + $0x20] sm:$0xff]  ;;  %v114_v27 = vld [vmem:[%s1855_s19 + $0x28] sm:$0xff] }
  0x31   :  { %v460_v24 = vld [vmem:[%s1867_s22 + $0xf0] sm:$0xff]  ;;  %v129_v26 = vld [vmem:[%s1855_s19 + $0xa0] sm:$0xff]  ;;  %v130_v28 = vld [vmem:[%s1855_s19 + $0xa8] sm:$0xff] }
  0x32   :  { %v115_v29 = vld [vmem:[%s1855_s19 + $0x30] sm:$0xff]  ;;  %v116_v31 = vld [vmem:[%s1855_s19 + $0x38] sm:$0xff]  ;;  %v117_v33 = vld [vmem:[%s1855_s19 + $0x40] sm:$0xff] }
  0x33   :  { %505 = vperm.xlu0 %1613, %v438_v43   ;;  %v131_v30 = vld [vmem:[%s1855_s19 + $0xb0] sm:$0xff]  ;;  %v132_v32 = vld [vmem:[%s1855_s19 + $0xb8] sm:$0xff]  ;;  %v134_v36 = vld [vmem:[%s1855_s19 + $0xc8] sm:$0xff] }
  0x34   :  { %520 = vperm.xlu1 %1614, %v441_v46   ;;  %v119_v37 = vld [vmem:[%s1855_s19 + $0x50] sm:$0xff]  ;;  %v120_v39 = vld [vmem:[%s1855_s19 + $0x58] sm:$0xff]  ;;  %v121_v41 = vld [vmem:[%s1855_s19 + $0x60] sm:$0xff] }
  0x35   :  { %1573 = vmatpush3.bf16.xpose.msra.mxu0 %v1572_v34  ;;  %1601 = vmatpush3.bf16.xpose.msra.mxu1 %v1572_v34  ;;  %v133_v34 = vld [vmem:[%s1855_s19 + $0xc0] sm:$0xff]  ;;  %v135_v38 = vld [vmem:[%s1855_s19 + $0xd0] sm:$0xff]  ;;  %v136_v40 = vld [vmem:[%s1855_s19 + $0xd8] sm:$0xff] }
  0x36   :  { %1575 = vmatprep.subr.bf16.mxu0 %v1574_v35  ;;  %1594 = vmatprep.subr.bf16.mxu1 %v1574_v35  ;;  %v118_v35 = vld [vmem:[%s1855_s19 + $0x48] sm:$0xff]  ;;  %v137_v42 = vld [vmem:[%s1855_s19 + $0xe0] sm:$0xff]  ;;  %v139_v46 = vld [vmem:[%s1855_s19 + $0xf0] sm:$0xff] }
  0x37   :  { %515 = vperm.xlu0 %1613, %v440_v47   ;;  %v122_v43 = vld [vmem:[%s1855_s19 + $0x68] sm:$0xff]  ;;  %v124_v47 = vld [vmem:[%s1855_s19 + $0x78] sm:$0xff] }
  0x38   :  { %530 = vperm.xlu1 %1614, %v443_v52   ;;  %v140_v48 = vld [vmem:[%s1855_s19 + $0xf8] sm:$0xff]  ;;  %v625_v52 = vshrl.u32 %v624_v49, 7 }
  0x3b   :  { %525 = vperm.xlu0 %1613, %v442_v53  }
  0x3c   :  { %540 = vperm.xlu1 %1614, %v445_v56   ;;  %v630_v56 = vsub.s32 1, %v625_v52 }
  0x3d   :  { %1577 = vmatpush3.bf16.xpose.msra.mxu0 %v1576_v44  ;;  %1602 = vmatpush3.bf16.xpose.msra.mxu1 %v1576_v44  ;;  %v138_v44 = vld [vmem:[%s1855_s19 + $0xe8] sm:$0xff] }
  0x3e   :  { %1579 = vmatprep.subr.bf16.mxu0 %v1578_v45  ;;  %1595 = vmatprep.subr.bf16.mxu1 %v1578_v45  ;;  %v123_v45 = vld [vmem:[%s1855_s19 + $0x70] sm:$0xff] }
  0x3f   :  { %535 = vperm.xlu0 %1613, %v444_v57   ;;  %v462_v57 = vld [vmem:[%s102_s27] sm:$0x3] }
  0x40   :  { %550 = vperm.xlu1 %1614, %v447_v62   ;;  %v1946_v61 = vrot.slane %v462_v57, %v630_v56 }
  0x43   :  { %545 = vperm.xlu0 %1613, %v446_v63  }
  0x44   :  { %560 = vperm.xlu1 %1614, %v449_v2  }
  0x45   :  { %1581 = vmatpush3.bf16.xpose.msra.mxu0 %v1580_v54  ;;  %1603 = vmatpush3.bf16.xpose.msra.mxu1 %v1580_v54 }
  0x46   :  { %1583 = vmatprep.subr.bf16.mxu0 %v1582_v55  ;;  %1596 = vmatprep.subr.bf16.mxu1 %v1582_v55  ;;  %v626_v55 = vsub.s32 0, %v625_v52 }
  0x47   :  { %555 = vperm.xlu0 %1613, %v448_v3  }
  0x48   :  { %570 = vperm.xlu1 %1614, %v451_v6   ;;  %v1944_v60 = vrot.slane %v462_v57, %v626_v55 }
  0x4b   :  { %565 = vperm.xlu0 %1613, %v450_v7  }
  0x4c   :  { %580 = vperm.xlu1 %1614, %v453_v9  }
  0x4d   :  { %1585 = vmatpush3.bf16.xpose.msra.mxu0 %v1584_v0  ;;  %1604 = vmatpush3.bf16.xpose.msra.mxu1 %v1584_v0 }
  0x4e   :  { %1587 = vmatprep.subr.bf16.mxu0 %v1586_v1  ;;  %1597 = vmatprep.subr.bf16.mxu1 %v1586_v1 }
  0x4f   :  { %575 = vperm.xlu0 %1613, %v452_v10  }
  0x50   :  { %590 = vperm.xlu1 %1614, %v455_v11  }
  0x53   :  { %585 = vperm.xlu0 %1613, %v454_v12  }
  0x54   :  { %600 = vperm.xlu1 %1614, %v457_v15  }
  0x55   :  { %1589 = vmatpush3.bf16.xpose.msra.mxu0 %v1588_v8  ;;  %1605 = vmatpush3.bf16.xpose.msra.mxu1 %v1588_v8 }
  0x57   :  { %595 = vperm.xlu0 %1613, %v456_v18  }
  0x58   :  { %610 = vperm.xlu1 %1614, %v459_v21  }
  0x5c   :  { %1495 = vmatmul.mubr.f32.vlgmr.msra.gmra.mrb[0].mxu0 %v1858_v16  ;;  %1527 = vmatmul.mubr.f32.vlgmr.msra.gmra.mrb[0].mxu1 %v1862_v17  ;;  %v458_v16 = vld [vmem:[%s1867_s22 + $0xe0] sm:$0xff]  ;;  %v112_v17 = vld [vmem:[%s1855_s19 + $0x18] sm:$0xff] }
  0x5d   :  { %1496 = vmatprep.mubr.f32.mxu0 %v110_v13  ;;  %1528 = vmatprep.mubr.f32.mxu1 %v126_v14 }
  0x5e   :  { %605 = vperm.xlu0 %1613, %v458_v16   ;;  %620 = vperm.xlu1 %1614, %v461_v23  }
  0x60   :  { %1497 = vmatmul.mubr.f32.gmra.mrb[2].mxu0 %v110_v13  ;;  %1529 = vmatmul.mubr.f32.gmra.mrb[2].mxu1 %v126_v14 }
  0x61   :  { %1498 = vmatprep.mubr.f32.mxu0 %v111_v19  ;;  %1530 = vmatprep.mubr.f32.mxu1 %v127_v20 }
  0x62   :  { %615 = vperm.xlu0 %1613, %v460_v24  }
  0x64   :  { %1499 = vmatmul.mubr.f32.gmra.mrb[4].mxu0 %v111_v19  ;;  %1531 = vmatmul.mubr.f32.gmra.mrb[4].mxu1 %v127_v20 }
  0x65   :  { %1500 = vmatprep.mubr.f32.mxu0 %v112_v17  ;;  %1532 = vmatprep.mubr.f32.mxu1 %v128_v22 }
  0x68   :  { %1501 = vmatmul.mubr.f32.gmra.mrb[6].mxu0 %v112_v17  ;;  %1533 = vmatmul.mubr.f32.gmra.mrb[6].mxu1 %v128_v22 }
  0x69   :  { %1502 = vmatprep.mubr.f32.mxu0 %v113_v25  ;;  %1534 = vmatprep.mubr.f32.mxu1 %v129_v26 }
  0x6c   :  { %1503 = vmatmul.mubr.f32.gmra.mrb[8].mxu0 %v113_v25  ;;  %1535 = vmatmul.mubr.f32.gmra.mrb[8].mxu1 %v129_v26 }
  0x6d   :  { %1504 = vmatprep.mubr.f32.mxu0 %v114_v27  ;;  %1536 = vmatprep.mubr.f32.mxu1 %v130_v28 }
  0x70   :  { %1505 = vmatmul.mubr.f32.gmra.mrb[10].mxu0 %v114_v27  ;;  %1537 = vmatmul.mubr.f32.gmra.mrb[10].mxu1 %v130_v28 }
  0x71   :  { %1506 = vmatprep.mubr.f32.mxu0 %v115_v29  ;;  %1538 = vmatprep.mubr.f32.mxu1 %v131_v30 }
  0x74   :  { %1507 = vmatmul.mubr.f32.gmra.mrb[12].mxu0 %v115_v29  ;;  %1539 = vmatmul.mubr.f32.gmra.mrb[12].mxu1 %v131_v30 }
  0x75   :  { %1508 = vmatprep.mubr.f32.mxu0 %v116_v31  ;;  %1540 = vmatprep.mubr.f32.mxu1 %v132_v32 }
  0x78   :  { %1509 = vmatmul.mubr.f32.gmra.mrb[14].mxu0 %v116_v31  ;;  %1541 = vmatmul.mubr.f32.gmra.mrb[14].mxu1 %v132_v32 }
  0x79   :  { %1510 = vmatprep.mubr.f32.mxu0 %v117_v33  ;;  %1542 = vmatprep.mubr.f32.mxu1 %v133_v34 }
  0x7c   :  { %1511 = vmatmul.mubr.f32.gmra.mrb[16].mxu0 %v117_v33  ;;  %1543 = vmatmul.mubr.f32.gmra.mrb[16].mxu1 %v133_v34 }
  0x7d   :  { %1512 = vmatprep.mubr.f32.mxu0 %v118_v35  ;;  %1544 = vmatprep.mubr.f32.mxu1 %v134_v36 }
  0x80   :  { %1513 = vmatmul.mubr.f32.gmra.mrb[18].mxu0 %v118_v35  ;;  %1545 = vmatmul.mubr.f32.gmra.mrb[18].mxu1 %v134_v36 }
  0x81   :  { %1514 = vmatprep.mubr.f32.mxu0 %v119_v37  ;;  %1546 = vmatprep.mubr.f32.mxu1 %v135_v38 }
  0x84   :  { %1515 = vmatmul.mubr.f32.gmra.mrb[20].mxu0 %v119_v37  ;;  %1547 = vmatmul.mubr.f32.gmra.mrb[20].mxu1 %v135_v38 }
  0x85   :  { %1516 = vmatprep.mubr.f32.mxu0 %v120_v39  ;;  %1548 = vmatprep.mubr.f32.mxu1 %v136_v40 }
  0x88   :  { %1517 = vmatmul.mubr.f32.gmra.mrb[22].mxu0 %v120_v39  ;;  %1549 = vmatmul.mubr.f32.gmra.mrb[22].mxu1 %v136_v40 }
  0x89   :  { %1518 = vmatprep.mubr.f32.mxu0 %v121_v41  ;;  %1550 = vmatprep.mubr.f32.mxu1 %v137_v42 }
  0x8c   :  { %1519 = vmatmul.mubr.f32.gmra.mrb[24].mxu0 %v121_v41  ;;  %1551 = vmatmul.mubr.f32.gmra.mrb[24].mxu1 %v137_v42 }
  0x8d   :  { %1520 = vmatprep.mubr.f32.mxu0 %v122_v43  ;;  %1552 = vmatprep.mubr.f32.mxu1 %v138_v44 }
  0x90   :  { %1521 = vmatmul.mubr.f32.gmra.mrb[26].mxu0 %v122_v43  ;;  %1553 = vmatmul.mubr.f32.gmra.mrb[26].mxu1 %v138_v44 }
  0x91   :  { %1522 = vmatprep.mubr.f32.mxu0 %v123_v45  ;;  %1554 = vmatprep.mubr.f32.mxu1 %v139_v46 }
  0x94   :  { %1523 = vmatmul.mubr.f32.gmra.mrb[28].mxu0 %v123_v45  ;;  %1555 = vmatmul.mubr.f32.gmra.mrb[28].mxu1 %v139_v46 }
  0x95   :  { %1524 = vmatprep.mubr.f32.mxu0 %v124_v47  ;;  %1556 = vmatprep.mubr.f32.mxu1 %v140_v48 }
  0x98   :  { %1525 = vmatmul.mubr.f32.gmra.mrb[30].mxu0 %v124_v47  ;;  %1557 = vmatmul.mubr.f32.gmra.mrb[30].mxu1 %v140_v48 }
  0x9f   :  { %v476_v50 = vpop.permute.xlu1 %475 }
  0xa0   :  { %v2005_v37 = vadd.f32 %v1944_v60, %v476_v50  ;;  %v2008_v38 = vadd.f32 %v1946_v61, %v476_v50 }
  0xa1   :  { %v466_v51 = vpop.permute.xlu0 %465 }
  0xa2   :  { %v634_v39 = vadd.f32 %v1944_v60, %v466_v51  ;;  %v635_v40 = vadd.f32 %v1946_v61, %v466_v51 }
  0xa3   :  { %v481_v53 = vpop.permute.xlu1 %480 }
  0xa4   :  { %v2013_v41 = vadd.f32 %v1944_v60, %v481_v53  ;;  %v2016_v42 = vadd.f32 %v1946_v61, %v481_v53 }
  0xa6   :  { %v471_v54 = vpop.permute.xlu0 %470 }
  0xa7   :  { %v491_v58 = vpop.permute.xlu1 %490  ;;  %v2019_v43 = vadd.f32 %v1944_v60, %v471_v54  ;;  %v2022_v44 = vadd.f32 %v1946_v61, %v471_v54 }
  0xa8   :  { %v2025_v45 = vadd.f32 %v1944_v60, %v491_v58  ;;  %v2028_v46 = vadd.f32 %v1946_v61, %v491_v58 }
  0xaa   :  { %v486_v59 = vpop.permute.xlu0 %485 }
  0xab   :  { %v501_v62 = vpop.permute.xlu1 %500  ;;  %v2031_v47 = vadd.f32 %v1944_v60, %v486_v59  ;;  %v2034_v48 = vadd.f32 %v1946_v61, %v486_v59 }
  0xac   :  { %v1949_v0 = vadd.f32 %v1944_v60, %v501_v62  ;;  %v1952_v1 = vadd.f32 %v1946_v61, %v501_v62 }
  0xae   :  { %v496_v63 = vpop.permute.xlu0 %495 }
  0xaf   :  { %v511_v2 = vpop.permute.xlu1 %510  ;;  %v2037_v49 = vadd.f32 %v1944_v60, %v496_v63  ;;  %v2040_v50 = vadd.f32 %v1946_v61, %v496_v63 }
  0xb0   :  { %v1955_v4 = vadd.f32 %v1944_v60, %v511_v2  ;;  %v1958_v5 = vadd.f32 %v1946_v61, %v511_v2 }
  0xb2   :  { %v506_v3 = vpop.permute.xlu0 %505  ;;  %3017 = vst [vmem:[#allocation11_spill] sm:$0xff] %v1955_v4  ;;  %3018 = vst [vmem:[#allocation12_spill] sm:$0xff] %v1958_v5 }
  0xb3   :  { %v1961_v6 = vadd.f32 %v1944_v60, %v506_v3  ;;  %v1964_v7 = vadd.f32 %v1946_v61, %v506_v3  ;;  %v521_v8 = vpop.permute.xlu1 %520 }
  0xb4   :  { %v1967_v10 = vadd.f32 %v1944_v60, %v521_v8  ;;  %v1970_v11 = vadd.f32 %v1946_v61, %v521_v8 }
  0xb5   :  { %3019 = vst [vmem:[#allocation13_spill] sm:$0xff] %v1961_v6  ;;  %3020 = vst [vmem:[#allocation14_spill] sm:$0xff] %v1964_v7 }
  0xb6   :  { %v516_v9 = vpop.permute.xlu0 %515  ;;  %3021 = vst [vmem:[#allocation15_spill] sm:$0xff] %v1967_v10  ;;  %3022 = vst [vmem:[#allocation16_spill] sm:$0xff] %v1970_v11 }
  0xb7   :  { %v1973_v12 = vadd.f32 %v1944_v60, %v516_v9  ;;  %v1976_v13 = vadd.f32 %v1946_v61, %v516_v9  ;;  %v531_v14 = vpop.permute.xlu1 %530 }
  0xb8   :  { %v1979_v18 = vadd.f32 %v1944_v60, %v531_v14  ;;  %v1982_v19 = vadd.f32 %v1946_v61, %v531_v14 }
  0xb9   :  { %3023 = vst [vmem:[#allocation17_spill] sm:$0xff] %v1973_v12  ;;  %3024 = vst [vmem:[#allocation18_spill] sm:$0xff] %v1976_v13 }
  0xba   :  { %v526_v15 = vpop.permute.xlu0 %525  ;;  %3025 = vst [vmem:[#allocation19_spill] sm:$0xff] %v1979_v18  ;;  %3026 = vst [vmem:[#allocation20_spill] sm:$0xff] %v1982_v19 }
  0xbb   :  { %v1985_v20 = vadd.f32 %v1944_v60, %v526_v15  ;;  %v1988_v21 = vadd.f32 %v1946_v61, %v526_v15  ;;  %v541_v16 = vpop.permute.xlu1 %540 }
  0xbc   :  { %v1991_v22 = vadd.f32 %v1944_v60, %v541_v16  ;;  %v1994_v23 = vadd.f32 %v1946_v61, %v541_v16 }
  0xbd   :  { %3027 = vst [vmem:[#allocation21_spill] sm:$0xff] %v1985_v20  ;;  %3028 = vst [vmem:[#allocation22_spill] sm:$0xff] %v1988_v21 }
  0xbe   :  { %v536_v17 = vpop.permute.xlu0 %535  ;;  %3029 = vst [vmem:[#allocation23_spill] sm:$0xff] %v1991_v22  ;;  %3030 = vst [vmem:[#allocation24_spill] sm:$0xff] %v1994_v23 }
  0xbf   :  { %v1997_v24 = vadd.f32 %v1944_v60, %v536_v17  ;;  %v2000_v25 = vadd.f32 %v1946_v61, %v536_v17  ;;  %v551_v26 = vpop.permute.xlu1 %550 }
  0xc0   :  { %v2043_v51 = vadd.f32 %v1944_v60, %v551_v26  ;;  %v2046_v52 = vadd.f32 %v1946_v61, %v551_v26 }
  0xc1   :  { %3031 = vst [vmem:[#allocation25_spill] sm:$0xff] %v1997_v24  ;;  %3032 = vst [vmem:[#allocation26_spill] sm:$0xff] %v2000_v25 }
  0xc2   :  { %v546_v27 = vpop.permute.xlu0 %545 }
  0xc3   :  { %v561_v28 = vpop.permute.xlu1 %560  ;;  %v666_v53 = vadd.f32 %v1944_v60, %v546_v27  ;;  %v667_v54 = vadd.f32 %v1946_v61, %v546_v27 }
  0xc4   :  { %v2051_v57 = vadd.f32 %v1944_v60, %v561_v28  ;;  %v2054_v58 = vadd.f32 %v1946_v61, %v561_v28 }
  0xc6   :  { %v556_v29 = vpop.permute.xlu0 %555 }
  0xc7   :  { %v571_v30 = vpop.permute.xlu1 %570  ;;  %v2057_v59 = vadd.f32 %v1944_v60, %v556_v29  ;;  %v2060_v62 = vadd.f32 %v1946_v61, %v556_v29 }
  0xc8   :  { %v2063_v3 = vadd.f32 %v1944_v60, %v571_v30  ;;  %v2066_v8 = vadd.f32 %v1946_v61, %v571_v30 }
  0xca   :  { %v566_v31 = vpop.permute.xlu0 %565 }
  0xcb   :  { %v581_v32 = vpop.permute.xlu1 %580  ;;  %v2069_v17 = vadd.f32 %v1944_v60, %v566_v31  ;;  %v2072_v26 = vadd.f32 %v1946_v61, %v566_v31 }
  0xcc   :  { %v2075_v29 = vadd.f32 %v1944_v60, %v581_v32  ;;  %v2078_v23 = vadd.f32 %v1946_v61, %v581_v32 }
  0xce   :  { %v576_v33 = vpop.permute.xlu0 %575 }
  0xcf   :  { %v591_v34 = vpop.permute.xlu1 %590 }
  0xd2   :  { %v586_v35 = vpop.permute.xlu0 %585 }
  0xd3   :  { %v2002_v36 = vpop.permute.xlu1 %600 }
  0xd6   :  { %v596_v55 = vpop.permute.xlu0 %595 }
  0xd7   :  { %v611_v56 = vpop.permute.xlu1 %610 }
  0xd8   :  { %v2123_v20 = vadd.f32 %v1944_v60, %v611_v56 }
  0xda   :  { %3041 = vst [vmem:[#allocation35_spill] sm:$0xff] %v2123_v20 }
 0x12f   :  { %v239_v63 = vpop.f32.mrb[0].mxu0  ;;  %v335_v2 = vpop.f32.mrb[0].mxu1 }
 0x130   :  { %v698_v9 = vmul.f32 2.0, %v239_v63  ;;  %v730_v14 = vmul.f32 2.0, %v335_v2  ;;  %v241_v15 = vpop.f32.mrb[1].mxu0  ;;  %v337_v16 = vpop.f32.mrb[1].mxu1  ;;  %v2081_v63 = vadd.f32 %v1944_v60, %v576_v33  ;;  %v2084_v2 = vadd.f32 %v1946_v61, %v576_v33 }
 0x131   :  { %v699_v27 = vmul.f32 2.0, %v241_v15  ;;  %v731_v28 = vmul.f32 2.0, %v337_v16  ;;  %v2087_v15 = vadd.f32 %v1944_v60, %v591_v34  ;;  %v2090_v16 = vadd.f32 %v1946_v61, %v591_v34 }
 0x132   :  { %v762_v30 = vsub.f32 %v634_v39, %v698_v9  ;;  %v794_v22 = vsub.f32 %v666_v53, %v730_v14  ;;  %v2097_v53 = vadd.f32 %v1944_v60, %v586_v35  ;;  %v2100_v33 = vadd.f32 %v1946_v61, %v586_v35 }
 0x133   :  { %v763_v25 = vsub.f32 %v635_v40, %v699_v27  ;;  %v795_v24 = vsub.f32 %v667_v54, %v731_v28  ;;  %v245_v31 = vpop.f32.mrb[2].mxu0  ;;  %v341_v19 = vpop.f32.mrb[2].mxu1  ;;  %3033 = vst [vmem:[#allocation27_spill] sm:$0xff] %v2087_v15  ;;  %3034 = vst [vmem:[#allocation28_spill] sm:$0xff] %v2090_v16  ;;  %v2108_v34 = vadd.f32 %v1944_v60, %v2002_v36 }
 0x134   :  { %v2092_v32 = vmax.f32 %v762_v30, 1e-12  ;;  %v2094_v39 = vmax.f32 %v794_v22, 1e-12  ;;  %3035 = vst [vmem:[#allocation29_spill] sm:$0xff] %v2097_v53  ;;  %3036 = vst [vmem:[#allocation30_spill] sm:$0xff] %v2100_v33  ;;  %v606_v27 = vpop.permute.xlu0 %605  ;;  %v621_v22 = vpop.permute.xlu1 %620  ;;  %v2113_v35 = vadd.f32 %v1946_v61, %v2002_v36 }
 0x135   :  { %v2102_v40 = vmax.f32 %v763_v25, 1e-12  ;;  %v2104_v54 = vmax.f32 %v795_v24, 1e-12  ;;  %v247_v9 = vpop.f32.mrb[3].mxu0  ;;  %v343_v14 = vpop.f32.mrb[3].mxu1  ;;  %v2116_v25 = vadd.f32 %v1944_v60, %v596_v55  ;;  %v2119_v24 = vadd.f32 %v1946_v61, %v596_v55 }
 0x136   :  { %3037 = vst [vmem:[#allocation31_spill] sm:$0xff] %v2108_v34  ;;  %1615 = vrsqrt.f32 %v2092_v32  ;;  %v700_v28 = vmul.f32 2.0, %v245_v31  ;;  %v732_v30 = vmul.f32 2.0, %v341_v19  ;;  %3038 = vst [vmem:[#allocation32_spill] sm:$0xff] %v2113_v35  ;;  %v2126_v31 = vadd.f32 %v1946_v61, %v611_v56 }
 0x137   :  { %3039 = vst [vmem:[#allocation33_spill] sm:$0xff] %v2116_v25  ;;  %3040 = vst [vmem:[#allocation34_spill] sm:$0xff] %v2119_v24  ;;  %1617 = vrsqrt.f32 %v2094_v39  ;;  %v251_v18 = vpop.f32.mrb[4].mxu0  ;;  %v347_v21 = vpop.f32.mrb[4].mxu1  ;;  %v2129_v19 = vadd.f32 %v1944_v60, %v606_v27  ;;  %v2133_v55 = vadd.f32 %v1946_v61, %v606_v27  ;;  %v2136_v11 = vadd.f32 %v1944_v60, %v621_v22 }
 0x138   :  { %3042 = vst [vmem:[#allocation36_spill] sm:$0xff] %v2126_v31  ;;  %1619 = vrsqrt.f32 %v2102_v40  ;;  %v253_v36 = vpop.f32.mrb[5].mxu0  ;;  %v349_v35 = vpop.f32.mrb[5].mxu1  ;;  %v2139_v34 = vadd.f32 %v1946_v61, %v621_v22  ;;  %vm892_vm0 = vcmp.eq.f32.partialorder %v2092_v32, inf  ;;  %v764_v56 = vsub.f32 %v2019_v43, %v700_v28 }
 0x139   :  { %3043 = vst [vmem:[#allocation37_spill] sm:$0xff] %v2129_v19  ;;  %3044 = vst [vmem:[#allocation38_spill] sm:$0xff] %v2133_v55  ;;  %1621 = vrsqrt.f32 %v2104_v54  ;;  %v796_v31 = vsub.f32 %v2043_v51, %v732_v30  ;;  %v701_v20 = vmul.f32 2.0, %v247_v9  ;;  %v733_v19 = vmul.f32 2.0, %v343_v14 }
 0x13a   :  { %3045 = vst [vmem:[#allocation39_spill] sm:$0xff] %v2136_v11  ;;  %3046 = vst [vmem:[#allocation40_spill] sm:$0xff] %v2139_v34  ;;  %vm894_vm1 = vcmp.eq.f32.partialorder %v2092_v32, 0.0  ;;  %v702_v27 = vmul.f32 2.0, %v251_v18  ;;  %v734_v55 = vmul.f32 2.0, %v347_v21  ;;  %v703_v10 = vmul.f32 2.0, %v253_v36 }
 0x13b   :  { %v2146_v24 = vpop.f32.mrb[6].mxu0  ;;  %v2148_v11 = vpop.f32.mrb[6].mxu1  ;;  %v2150_v22 = vmax.f32 %v764_v56, 1e-12  ;;  %v2152_v34 = vmax.f32 %v796_v31, 1e-12  ;;  %v765_v13 = vsub.f32 %v2022_v44, %v701_v20  ;;  %v797_v43 = vsub.f32 %v2046_v52, %v733_v19 }
 0x13c   :  { %v2156_v51 = vpop.f32.mrb[7].mxu0  ;;  %v2158_v9 = vpop.f32.mrb[7].mxu1  ;;  %v895_v18 = vand.u32 2147483648, %v2092_v32  ;;  %vm1116_vm2 = vcmp.eq.f32.partialorder %v2094_v39, inf  ;;  %vm1118_vm3 = vcmp.eq.f32.partialorder %v2094_v39, 0.0  ;;  %v735_v21 = vmul.f32 2.0, %v349_v35 }
 0x13d   :  { %v1119_v14 = vand.u32 2147483648, %v2094_v39  ;;  %vm899_vm4 = vcmp.eq.f32.partialorder %v2102_v40, inf  ;;  %1623 = vrsqrt.f32 %v2150_v22  ;;  %v766_v20 = vsub.f32 %v2005_v37, %v702_v27 }
 0x13e   :  { %vm901_vm5 = vcmp.eq.f32.partialorder %v2102_v40, 0.0  ;;  %v902_v44 = vand.u32 2147483648, %v2102_v40  ;;  %1625 = vrsqrt.f32 %v2152_v34  ;;  %v798_v52 = vsub.f32 %v2057_v59, %v734_v55 }
 0x13f   :  { %v2171_v28 = vpop.f32.mrb[8].mxu0  ;;  %v2173_v30 = vpop.f32.mrb[8].mxu1  ;;  %vm1123_vm6 = vcmp.eq.f32.partialorder %v2104_v54, inf  ;;  %v2176_v31 = vmax.f32 %v765_v13, 1e-12  ;;  %v767_v37 = vsub.f32 %v2008_v38, %v703_v10  ;;  %vm1125_vm7 = vcmp.eq.f32.partialorder %v2104_v54, 0.0 }
 0x140   :  { %v1616_v35 = vpop.eup %1615  ;;  %v2178_v19 = vmax.f32 %v797_v43, 1e-12  ;;  %v1126_v59 = vand.u32 2147483648, %v2104_v54  ;;  %v799_v55 = vsub.f32 %v2060_v62, %v735_v21  ;;  %vm906_vm8 = vcmp.eq.f32.partialorder %v2150_v22, inf  ;;  %v2190_v43 = vpop.f32.mrb[9].mxu0 }
 0x141   :  { %v1618_v36 = vpop.eup %1617  ;;  %v891_v56 = vmul.f32 %v1616_v35, %v2092_v32  ;;  %1627 = vrsqrt.f32 %v2176_v31  ;;  %v2188_v13 = vmax.f32 %v766_v20, 1e-12  ;;  %v2192_v10 = vpop.f32.mrb[9].mxu1  ;;  %v2199_v21 = vmax.f32 %v798_v52, 1e-12 }
 0x142   :  { %v1620_v27 = vpop.eup %1619  ;;  %v1115_v25 = vmul.f32 %v1618_v36, %v2094_v39  ;;  %1629 = vrsqrt.f32 %v2178_v19  ;;  %vm908_vm9 = vcmp.eq.f32.partialorder %v2150_v22, 0.0  ;;  %vm1130_vm10 = vcmp.eq.f32.partialorder %v2152_v34, inf }
 0x143   :  { %v1622_v38 = vpop.eup %1621  ;;  %v893_v35 = vsel %vm892_vm0, %v2092_v32, %v891_v56  ;;  %v898_v62 = vmul.f32 %v1620_v27, %v2102_v40  ;;  %v2201_v36 = vpop.f32.mrb[10].mxu0  ;;  %v2211_v56 = vmax.f32 %v767_v37, 1e-12  ;;  %1631 = vrsqrt.f32 %v2188_v13 }
 0x144   :  { %v2203_v12 = vpop.f32.mrb[10].mxu1  ;;  %v896_v20 = vsel %vm894_vm1, %v895_v18, %v893_v35  ;;  %v1117_v16 = vsel %vm1116_vm2, %v2094_v39, %v1115_v25  ;;  %v1122_v5 = vmul.f32 %v1622_v38, %v2104_v54  ;;  %v2213_v27 = vpop.f32.mrb[11].mxu0  ;;  %v909_v25 = vand.u32 2147483648, %v2150_v22 }
 0x145   :  { %v2215_v15 = vpop.f32.mrb[11].mxu1  ;;  %1338 = vst [vmem:[#allocation8] sm:$0xff] %v896_v20  ;;  %v1120_v52 = vsel %vm1118_vm3, %v1119_v14, %v1117_v16  ;;  %v900_v32 = vsel %vm899_vm4, %v2102_v40, %v898_v62  ;;  %v2230_v39 = vmax.f32 %v799_v55, 1e-12  ;;  %vm1132_vm11 = vcmp.eq.f32.partialorder %v2152_v34, 0.0 }
 0x146   :  { %1370 = vst [vmem:[#allocation8 + $0x100] sm:$0xff] %v1120_v52  ;;  %v903_v18 = vsel %vm901_vm5, %v902_v44, %v900_v32  ;;  %v1124_v37 = vsel %vm1123_vm6, %v2104_v54, %v1122_v5  ;;  %1633 = vrsqrt.f32 %v2199_v21  ;;  %v1133_v5 = vand.u32 2147483648, %v2152_v34 }
 0x147   :  { %1339 = vst [vmem:[#allocation8 + $0x8] sm:$0xff] %v903_v18  ;;  %v1127_v16 = vsel %vm1125_vm7, %v1126_v59, %v1124_v37  ;;  %v2237_v40 = vpop.f32.mrb[12].mxu0  ;;  %v2239_v14 = vpop.f32.mrb[12].mxu1  ;;  %vm913_vm12 = vcmp.eq.f32.partialorder %v2176_v31, inf  ;;  %vm915_vm13 = vcmp.eq.f32.partialorder %v2176_v31, 0.0  ;;  %1635 = vrsqrt.f32 %v2211_v56 }
 0x148   :  { %v1624_v44 = vpop.eup %1623  ;;  %1371 = vst [vmem:[#allocation8 + $0x108] sm:$0xff] %v1127_v16  ;;  %v2245_v54 = vpop.f32.mrb[13].mxu0  ;;  %v916_v35 = vand.u32 2147483648, %v2176_v31  ;;  %vm1137_vm14 = vcmp.eq.f32.partialorder %v2178_v19, inf  ;;  %vm1139_vm15 = vcmp.eq.f32.partialorder %v2178_v19, 0.0  ;;  %v1140_v20 = vand.u32 2147483648, %v2178_v19 }
 0x149   :  { %v2247_v59 = vpop.f32.mrb[13].mxu1  ;;  %v1626_v55 = vpop.eup %1625  ;;  %v905_v38 = vmul.f32 %v1624_v44, %v2150_v22  ;;  %vm920_vm0 = vcmp.eq.f32.partialorder %v2188_v13, inf  ;;  %1637 = vrsqrt.f32 %v2230_v39  ;;  %vm922_vm1 = vcmp.eq.f32.partialorder %v2188_v13, 0.0 }
 0x14a   :  { %v1129_v62 = vmul.f32 %v1626_v55, %v2152_v34  ;;  %v704_v32 = vmul.f32 2.0, %v2146_v24  ;;  %v736_v18 = vmul.f32 2.0, %v2148_v11  ;;  %v737_v33 = vmul.f32 2.0, %v2158_v9 }
 0x14b   :  { %v907_v52 = vsel %vm906_vm8, %v2150_v22, %v905_v38  ;;  %v2263_v37 = vpop.f32.mrb[14].mxu0  ;;  %v2265_v16 = vpop.f32.mrb[14].mxu1  ;;  %v705_v38 = vmul.f32 2.0, %v2156_v51  ;;  %v923_v9 = vand.u32 2147483648, %v2188_v13  ;;  %vm1144_vm2 = vcmp.eq.f32.partialorder %v2199_v21, inf }
 0x14c   :  { %v1628_v44 = vpop.eup %1627  ;;  %v910_v55 = vsel %vm908_vm9, %v909_v25, %v907_v52  ;;  %v1131_v4 = vsel %vm1130_vm10, %v2152_v34, %v1129_v62  ;;  %v2274_v7 = vpop.f32.mrb[15].mxu0  ;;  %v768_v25 = vsub.f32 %v2013_v41, %v704_v32  ;;  %v800_v52 = vsub.f32 %v2051_v57, %v736_v18 }
 0x14d   :  { %v2276_v24 = vpop.f32.mrb[15].mxu1  ;;  %v1630_v11 = vpop.eup %1629  ;;  %1340 = vst [vmem:[#allocation8 + $0x10] sm:$0xff] %v910_v55  ;;  %v1134_v53 = vsel %vm1132_vm11, %v1133_v5, %v1131_v4  ;;  %v912_v22 = vmul.f32 %v1628_v44, %v2176_v31  ;;  %v769_v62 = vsub.f32 %v2016_v42, %v705_v38  ;;  %v801_v6 = vsub.f32 %v2054_v58, %v737_v33 }
 0x14e   :  { %1372 = vst [vmem:[#allocation8 + $0x110] sm:$0xff] %v1134_v53  ;;  %v1136_v51 = vmul.f32 %v1630_v11, %v2178_v19  ;;  %v2291_v4 = vmax.f32 %v768_v25, 1e-12  ;;  %v2293_v41 = vmax.f32 %v800_v52, 1e-12  ;;  %v1632_v53 = vpop.eup %1631  ;;  %vm1146_vm3 = vcmp.eq.f32.partialorder %v2199_v21, 0.0  ;;  %v2316_v11 = vpop.permute.xlu0 %615 }
 0x14f   :  { %v914_v34 = vsel %vm913_vm12, %v2176_v31, %v912_v22  ;;  %v2295_v57 = vpop.f32.mrb[16].mxu0  ;;  %v2303_v58 = vmax.f32 %v769_v62, 1e-12  ;;  %v2305_v33 = vpop.f32.mrb[16].mxu1  ;;  %v919_v31 = vmul.f32 %v1632_v53, %v2188_v13  ;;  %vm927_vm4 = vcmp.eq.f32.partialorder %v2211_v56, inf }
 0x150   :  { %v917_v5 = vsel %vm915_vm13, %v916_v35, %v914_v34  ;;  %v1138_v42 = vsel %vm1137_vm14, %v2178_v19, %v1136_v51  ;;  %v2307_v32 = vpop.f32.mrb[17].mxu0  ;;  %v1634_v18 = vpop.eup %1633  ;;  %v1147_v35 = vand.u32 2147483648, %v2199_v21  ;;  %1639 = vrsqrt.f32 %v2291_v4 }
 0x151   :  { %1341 = vst [vmem:[#allocation8 + $0x18] sm:$0xff] %v917_v5  ;;  %v1141_v44 = vsel %vm1139_vm15, %v1140_v20, %v1138_v42  ;;  %v2314_v55 = vpop.f32.mrb[17].mxu1  ;;  %v1636_v38 = vpop.eup %1635  ;;  %v1143_v22 = vmul.f32 %v1634_v18, %v2199_v21  ;;  %1641 = vrsqrt.f32 %v2293_v41  ;;  %v2321_v19 = vmax.f32 %v801_v6, 1e-12 }
 0x152   :  { %1373 = vst [vmem:[#allocation8 + $0x118] sm:$0xff] %v1141_v44  ;;  %v921_v20 = vsel %vm920_vm0, %v2188_v13, %v919_v31  ;;  %v926_v25 = vmul.f32 %v1636_v38, %v2211_v56  ;;  %v930_v52 = vand.u32 2147483648, %v2211_v56  ;;  %v706_v51 = vmul.f32 2.0, %v2171_v28 }
 0x153   :  { %v2329_v62 = vpop.f32.mrb[18].mxu0  ;;  %v2331_v34 = vpop.f32.mrb[18].mxu1  ;;  %v924_v5 = vsel %vm922_vm1, %v923_v9, %v921_v20  ;;  %v1145_v6 = vsel %vm1144_vm2, %v2199_v21, %v1143_v22  ;;  %1643 = vrsqrt.f32 %v2303_v58  ;;  %v738_v42 = vmul.f32 2.0, %v2173_v30 }
 0x154   :  { %v1638_v53 = vpop.eup %1637  ;;  %v2340_v18 = vpop.f32.mrb[19].mxu0  ;;  %1342 = vst [vmem:[#allocation8 + $0x20] sm:$0xff] %v924_v5  ;;  %v1148_v28 = vsel %vm1146_vm3, %v1147_v35, %v1145_v6  ;;  %v928_v13 = vsel %vm927_vm4, %v2211_v56, %v926_v25  ;;  %vm929_vm5 = vcmp.eq.f32.partialorder %v2211_v56, 0.0  ;;  %vm1151_vm6 = vcmp.eq.f32.partialorder %v2230_v39, inf }
 0x155   :  { %v2342_v44 = vpop.f32.mrb[19].mxu1  ;;  %v1150_v9 = vmul.f32 %v1638_v53, %v2230_v39  ;;  %1374 = vst [vmem:[#allocation8 + $0x120] sm:$0xff] %v1148_v28  ;;  %v931_v31 = vsel %vm929_vm5, %v930_v52, %v928_v13  ;;  %v1154_v30 = vand.u32 2147483648, %v2230_v39  ;;  %1645 = vrsqrt.f32 %v2321_v19 }
 0x156   :  { %v2356_v21 = vadd.f32 %v1944_v60, %v2316_v11  ;;  %1343 = vst [vmem:[#allocation8 + $0x28] sm:$0xff] %v931_v31  ;;  %vm1153_vm7 = vcmp.eq.f32.partialorder %v2230_v39, 0.0  ;;  %vm934_vm8 = vcmp.eq.f32.partialorder %v2291_v4, inf  ;;  %v770_v20 = vsub.f32 %v2031_v47, %v706_v51 }
 0x157   :  { %v1152_v35 = vsel %vm1151_vm6, %v2230_v39, %v1150_v9  ;;  %v2361_v56 = vpop.f32.mrb[20].mxu0  ;;  %v2363_v38 = vpop.f32.mrb[20].mxu1  ;;  %v802_v25 = vsub.f32 %v2069_v17, %v738_v42  ;;  %v707_v52 = vmul.f32 2.0, %v2190_v43  ;;  %vm936_vm9 = vcmp.eq.f32.partialorder %v2291_v4, 0.0 }
 0x158   :  { %3047 = vst [vmem:[#allocation41_spill] sm:$0xff] %v2356_v21  ;;  %v1155_v22 = vsel %vm1153_vm7, %v1154_v30, %v1152_v35  ;;  %v2368_v60 = vpop.f32.mrb[21].mxu0  ;;  %v2370_v53 = vpop.f32.mrb[21].mxu1  ;;  %v739_v39 = vmul.f32 2.0, %v2192_v10  ;;  %v708_v5 = vmul.f32 2.0, %v2201_v36  ;;  %v709_v6 = vmul.f32 2.0, %v2213_v27 }
 0x159   :  { %1375 = vst [vmem:[#allocation8 + $0x128] sm:$0xff] %v1155_v22  ;;  %v2376_v28 = vmax.f32 %v770_v20, 1e-12  ;;  %v2378_v47 = vmax.f32 %v802_v25, 1e-12  ;;  %v771_v17 = vsub.f32 %v2034_v48, %v707_v52  ;;  %v740_v43 = vmul.f32 2.0, %v2203_v12 }
 0x15a   :  { %v1640_v51 = vpop.eup %1639  ;;  %v937_v42 = vand.u32 2147483648, %v2291_v4  ;;  %vm1158_vm10 = vcmp.eq.f32.partialorder %v2293_v41, inf  ;;  %v803_v13 = vsub.f32 %v2072_v26, %v739_v39  ;;  %v773_v10 = vsub.f32 %v2028_v46, %v709_v6 }
 0x15b   :  { %v2386_v36 = vpop.f32.mrb[22].mxu0  ;;  %v2388_v27 = vpop.f32.mrb[22].mxu1  ;;  %v933_v31 = vmul.f32 %v1640_v51, %v2291_v4  ;;  %vm1160_vm11 = vcmp.eq.f32.partialorder %v2293_v41, 0.0  ;;  %v1161_v12 = vand.u32 2147483648, %v2293_v41  ;;  %1647 = vrsqrt.f32 %v2376_v28 }
 0x15c   :  { %v1642_v9 = vpop.eup %1641  ;;  %v2394_v48 = vpop.f32.mrb[23].mxu0  ;;  %vm941_vm12 = vcmp.eq.f32.partialorder %v2303_v58, inf  ;;  %vm943_vm13 = vcmp.eq.f32.partialorder %v2303_v58, 0.0  ;;  %1649 = vrsqrt.f32 %v2378_v47  ;;  %v2405_v22 = vmax.f32 %v771_v17, 1e-12 }
 0x15d   :  { %v2396_v30 = vpop.f32.mrb[23].mxu1  ;;  %v1157_v26 = vmul.f32 %v1642_v9, %v2293_v41  ;;  %v1644_v46 = vpop.eup %1643  ;;  %v935_v35 = vsel %vm934_vm8, %v2291_v4, %v933_v31  ;;  %v772_v20 = vsub.f32 %v2025_v45, %v708_v5  ;;  %v804_v25 = vsub.f32 %v2063_v3, %v740_v43 }
 0x15e   :  { %v938_v52 = vsel %vm936_vm9, %v937_v42, %v935_v35  ;;  %v940_v6 = vmul.f32 %v1644_v46, %v2303_v58  ;;  %v2415_v51 = vmax.f32 %v803_v13, 1e-12  ;;  %v944_v3 = vand.u32 2147483648, %v2303_v58 }
 0x15f   :  { %v1159_v39 = vsel %vm1158_vm10, %v2293_v41, %v1157_v26  ;;  %v2417_v9 = vpop.f32.mrb[24].mxu0  ;;  %v2419_v31 = vpop.f32.mrb[24].mxu1  ;;  %1344 = vst [vmem:[#allocation8 + $0x30] sm:$0xff] %v938_v52  ;;  %1651 = vrsqrt.f32 %v2405_v22  ;;  %v741_v4 = vmul.f32 2.0, %v2215_v15  ;;  %vm1165_vm14 = vcmp.eq.f32.partialorder %v2321_v19, inf }
 0x160   :  { %v1646_v17 = vpop.eup %1645  ;;  %v1162_v45 = vsel %vm1160_vm11, %v1161_v12, %v1159_v39  ;;  %v2426_v5 = vpop.f32.mrb[25].mxu0  ;;  %v942_v42 = vsel %vm941_vm12, %v2303_v58, %v940_v6  ;;  %1653 = vrsqrt.f32 %v2415_v51  ;;  %vm1167_vm15 = vcmp.eq.f32.partialorder %v2321_v19, 0.0 }
 0x161   :  { %v2428_v43 = vpop.f32.mrb[25].mxu1  ;;  %1376 = vst [vmem:[#allocation8 + $0x130] sm:$0xff] %v1162_v45  ;;  %v1164_v13 = vmul.f32 %v1646_v17, %v2321_v19  ;;  %v945_v41 = vsel %vm943_vm13, %v944_v3, %v942_v42  ;;  %v1168_v15 = vand.u32 2147483648, %v2321_v19  ;;  %vm948_vm0 = vcmp.eq.f32.partialorder %v2376_v28, inf }
 0x162   :  { %1345 = vst [vmem:[#allocation8 + $0x38] sm:$0xff] %v945_v41  ;;  %v2442_v26 = vmax.f32 %v772_v20, 1e-12  ;;  %v2444_v46 = vmax.f32 %v804_v25, 1e-12  ;;  %vm950_vm1 = vcmp.eq.f32.partialorder %v2376_v28, 0.0  ;;  %v805_v58 = vsub.f32 %v2066_v8, %v741_v4 }
 0x163   :  { %v1166_v12 = vsel %vm1165_vm14, %v2321_v19, %v1164_v13  ;;  %v2446_v35 = vmax.f32 %v773_v10, 1e-12  ;;  %v710_v39 = vmul.f32 2.0, %v2237_v40  ;;  %v2451_v6 = vpop.f32.mrb[26].mxu0  ;;  %v2453_v17 = vpop.f32.mrb[26].mxu1  ;;  %v951_v19 = vand.u32 2147483648, %v2376_v28 }
 0x164   :  { %v1169_v52 = vsel %vm1167_vm15, %v1168_v15, %v1166_v12  ;;  %vm1172_vm2 = vcmp.eq.f32.partialorder %v2378_v47, inf  ;;  %1655 = vrsqrt.f32 %v2442_v26  ;;  %v742_v10 = vmul.f32 2.0, %v2239_v14  ;;  %v2459_v20 = vpop.f32.mrb[27].mxu0  ;;  %v2461_v25 = vpop.f32.mrb[27].mxu1 }
 0x165   :  { %1377 = vst [vmem:[#allocation8 + $0x138] sm:$0xff] %v1169_v52  ;;  %v1648_v8 = vpop.eup %1647  ;;  %vm1174_vm3 = vcmp.eq.f32.partialorder %v2378_v47, 0.0  ;;  %v1175_v40 = vand.u32 2147483648, %v2378_v47  ;;  %vm955_vm4 = vcmp.eq.f32.partialorder %v2405_v22, inf  ;;  %1657 = vrsqrt.f32 %v2444_v46 }
 0x166   :  { %v1650_v45 = vpop.eup %1649  ;;  %v947_v3 = vmul.f32 %v1648_v8, %v2376_v28  ;;  %vm957_vm5 = vcmp.eq.f32.partialorder %v2405_v22, 0.0  ;;  %v958_v14 = vand.u32 2147483648, %v2405_v22  ;;  %1659 = vrsqrt.f32 %v2446_v35 }
 0x167   :  { %v2471_v4 = vpop.f32.mrb[28].mxu0  ;;  %v2473_v42 = vpop.f32.mrb[28].mxu1  ;;  %v1171_v13 = vmul.f32 %v1650_v45, %v2378_v47  ;;  %vm1179_vm6 = vcmp.eq.f32.partialorder %v2415_v51, inf  ;;  %v2477_v41 = vmax.f32 %v805_v58, 1e-12  ;;  %v774_v15 = vsub.f32 %v2037_v49, %v710_v39 }
 0x168   :  { %3048 = vst [vmem:[#allocation42_spill] sm:$0xff] %v2471_v4  ;;  %3049 = vst [vmem:[#allocation43_spill] sm:$0xff] %v2473_v42  ;;  %v2480_v12 = vpop.f32.mrb[29].mxu0  ;;  %v2482_v52 = vpop.f32.mrb[29].mxu1  ;;  %v949_v8 = vsel %vm948_vm0, %v2376_v28, %v947_v3  ;;  %v806_v21 = vsub.f32 %v2081_v63, %v742_v10  ;;  %v711_v42 = vmul.f32 2.0, %v2245_v54  ;;  %v743_v45 = vmul.f32 2.0, %v2247_v59 }
 0x169   :  { %v1652_v4 = vpop.eup %1651  ;;  %v952_v58 = vsel %vm950_vm1, %v951_v19, %v949_v8  ;;  %v1173_v49 = vsel %vm1172_vm2, %v2378_v47, %v1171_v13  ;;  %vm1181_vm7 = vcmp.eq.f32.partialorder %v2415_v51, 0.0  ;;  %1661 = vrsqrt.f32 %v2477_v41 }
 0x16a   :  { %v1654_v39 = vpop.eup %1653  ;;  %1346 = vst [vmem:[#allocation8 + $0x40] sm:$0xff] %v952_v58  ;;  %v1176_v63 = vsel %vm1174_vm3, %v1175_v40, %v1173_v49  ;;  %v954_v54 = vmul.f32 %v1652_v4, %v2405_v22  ;;  %v1182_v59 = vand.u32 2147483648, %v2415_v51  ;;  %vm962_vm8 = vcmp.eq.f32.partialorder %v2442_v26, inf }
 0x16b   :  { %v2502_v28 = vpop.f32.mrb[30].mxu0  ;;  %v2504_v19 = vpop.f32.mrb[30].mxu1  ;;  %1378 = vst [vmem:[#allocation8 + $0x140] sm:$0xff] %v1176_v63  ;;  %v1178_v10 = vmul.f32 %v1654_v39, %v2415_v51  ;;  %v2507_v3 = vmax.f32 %v774_v15, 1e-12  ;;  %v775_v47 = vsub.f32 %v2040_v50, %v711_v42  ;;  %vm964_vm9 = vcmp.eq.f32.partialorder %v2442_v26, 0.0 }
 0x16c   :  { %v2509_v13 = vmax.f32 %v806_v21, 1e-12  ;;  %v2512_v40 = vpop.f32.mrb[31].mxu0  ;;  %v2514_v4 = vpop.f32.mrb[31].mxu1  ;;  %v956_v8 = vsel %vm955_vm4, %v2405_v22, %v954_v54  ;;  %v807_v58 = vsub.f32 %v2084_v2, %v743_v45  ;;  %v712_v49 = vmul.f32 2.0, %v2263_v37 }
 0x16d   :  { %v959_v21 = vsel %vm957_vm5, %v958_v14, %v956_v8  ;;  %v1180_v50 = vsel %vm1179_vm6, %v2415_v51, %v1178_v10  ;;  %1663 = vrsqrt.f32 %v2507_v3  ;;  %v744_v42 = vmul.f32 2.0, %v2265_v16 }
 0x16e   :  { %v1656_v15 = vpop.eup %1655  ;;  %1347 = vst [vmem:[#allocation8 + $0x48] sm:$0xff] %v959_v21  ;;  %v1183_v39 = vsel %vm1181_vm7, %v1182_v59, %v1180_v50  ;;  %v965_v2 = vand.u32 2147483648, %v2442_v26  ;;  %vm1186_vm10 = vcmp.eq.f32.partialorder %v2444_v46, inf  ;;  %1665 = vrsqrt.f32 %v2509_v13 }
 0x16f   :  { %v1658_v37 = vpop.eup %1657  ;;  %1379 = vst [vmem:[#allocation8 + $0x148] sm:$0xff] %v1183_v39  ;;  %v961_v22 = vmul.f32 %v1656_v15, %v2442_v26  ;;  %vm1188_vm11 = vcmp.eq.f32.partialorder %v2444_v46, 0.0  ;;  %v1189_v14 = vand.u32 2147483648, %v2444_v46  ;;  %vm969_vm12 = vcmp.eq.f32.partialorder %v2446_v35, inf }
 0x170   :  { %v1660_v16 = vpop.eup %1659  ;;  %v1185_v51 = vmul.f32 %v1658_v37, %v2444_v46  ;;  %v2539_v45 = vmax.f32 %v775_v47, 1e-12  ;;  %v2541_v63 = vmax.f32 %v807_v58, 1e-12  ;;  %v776_v54 = vsub.f32 %v1949_v0, %v712_v49 }
 0x171   :  { %v963_v59 = vsel %vm962_vm8, %v2442_v26, %v961_v22  ;;  %v968_v10 = vmul.f32 %v1660_v16, %v2446_v35  ;;  %v972_v8 = vand.u32 2147483648, %v2446_v35  ;;  %v808_v21 = vsub.f32 %v2075_v29, %v744_v42 }
 0x172   :  { %v966_v50 = vsel %vm964_vm9, %v965_v2, %v963_v59  ;;  %v1187_v47 = vsel %vm1186_vm10, %v2444_v46, %v1185_v51  ;;  %1667 = vrsqrt.f32 %v2539_v45  ;;  %v713_v0 = vmul.f32 2.0, %v2274_v7  ;;  %v3050_v59 = vld [vmem:[#allocation13_spill] sm:$0xff] }
 0x173   :  { %v1662_v58 = vpop.eup %1661  ;;  %v2559_v49 = vadd.f32 %v1946_v61, %v2316_v11  ;;  %1348 = vst [vmem:[#allocation8 + $0x50] sm:$0xff] %v966_v50  ;;  %v1190_v29 = vsel %vm1188_vm11, %v1189_v14, %v1187_v47  ;;  %v970_v26 = vsel %vm969_vm12, %v2446_v35, %v968_v10  ;;  %vm971_vm13 = vcmp.eq.f32.partialorder %v2446_v35, 0.0 }
 0x174   :  { %1380 = vst [vmem:[#allocation8 + $0x150] sm:$0xff] %v1190_v29  ;;  %v973_v42 = vsel %vm971_vm13, %v972_v8, %v970_v26  ;;  %v1192_v15 = vmul.f32 %v1662_v58, %v2477_v41  ;;  %vm1193_vm14 = vcmp.eq.f32.partialorder %v2477_v41, inf  ;;  %1669 = vrsqrt.f32 %v2541_v63  ;;  %v3051_v29 = vld [vmem:[#allocation29_spill] sm:$0xff] }
 0x175   :  { %1349 = vst [vmem:[#allocation8 + $0x58] sm:$0xff] %v973_v42  ;;  %vm1195_vm15 = vcmp.eq.f32.partialorder %v2477_v41, 0.0  ;;  %v1196_v61 = vand.u32 2147483648, %v2477_v41  ;;  %v2572_v7 = vmax.f32 %v776_v54, 1e-12  ;;  %v777_v35 = vsub.f32 %v1952_v1, %v713_v0 }
 0x176   :  { %v2574_v11 = vmax.f32 %v808_v21, 1e-12  ;;  %v1194_v46 = vsel %vm1193_vm14, %v2477_v41, %v1192_v15  ;;  %v745_v39 = vmul.f32 2.0, %v2276_v24  ;;  %v714_v2 = vmul.f32 2.0, %v2295_v57 }
 0x177   :  { %v1664_v37 = vpop.eup %1663  ;;  %v1197_v22 = vsel %vm1195_vm15, %v1196_v61, %v1194_v46  ;;  %vm976_vm0 = vcmp.eq.f32.partialorder %v2507_v3, inf  ;;  %vm978_vm1 = vcmp.eq.f32.partialorder %v2507_v3, 0.0  ;;  %1671 = vrsqrt.f32 %v2572_v7 }
 0x178   :  { %v1666_v14 = vpop.eup %1665  ;;  %1381 = vst [vmem:[#allocation8 + $0x158] sm:$0xff] %v1197_v22  ;;  %v975_v16 = vmul.f32 %v1664_v37, %v2507_v3  ;;  %v979_v41 = vand.u32 2147483648, %v2507_v3  ;;  %vm1200_vm2 = vcmp.eq.f32.partialorder %v2509_v13, inf  ;;  %1673 = vrsqrt.f32 %v2574_v11  ;;  %v3052_v22 = vld [vmem:[#allocation14_spill] sm:$0xff] }
 0x179   :  { %v1199_v1 = vmul.f32 %v1666_v14, %v2509_v13  ;;  %vm1202_vm3 = vcmp.eq.f32.partialorder %v2509_v13, 0.0  ;;  %v1203_v24 = vand.u32 2147483648, %v2509_v13  ;;  %v2590_v57 = vmax.f32 %v777_v35, 1e-12 }
 0x17a   :  { %v977_v51 = vsel %vm976_vm0, %v2507_v3, %v975_v16  ;;  %v809_v54 = vsub.f32 %v2078_v23, %v745_v39  ;;  %v778_v10 = vsub.f32 %v3050_v59, %v714_v2  ;;  %v746_v8 = vmul.f32 2.0, %v2305_v33 }
 0x17b   :  { %v980_v21 = vsel %vm978_vm1, %v979_v41, %v977_v51  ;;  %v1201_v50 = vsel %vm1200_vm2, %v2509_v13, %v1199_v1  ;;  %vm983_vm4 = vcmp.eq.f32.partialorder %v2539_v45, inf  ;;  %1675 = vrsqrt.f32 %v2590_v57 }
 0x17c   :  { %v1668_v47 = vpop.eup %1667  ;;  %1350 = vst [vmem:[#allocation8 + $0x60] sm:$0xff] %v980_v21  ;;  %v1204_v0 = vsel %vm1202_vm3, %v1203_v24, %v1201_v50  ;;  %vm985_vm5 = vcmp.eq.f32.partialorder %v2539_v45, 0.0  ;;  %v986_v23 = vand.u32 2147483648, %v2539_v45  ;;  %v2603_v58 = vmax.f32 %v809_v54, 1e-12 }
 0x17d   :  { %1382 = vst [vmem:[#allocation8 + $0x160] sm:$0xff] %v1204_v0  ;;  %v982_v33 = vmul.f32 %v1668_v47, %v2539_v45  ;;  %v2606_v3 = vmax.f32 %v778_v10, 1e-12  ;;  %v810_v13 = vsub.f32 %v3051_v29, %v746_v8  ;;  %v715_v26 = vmul.f32 2.0, %v2307_v32  ;;  %v3054_v10 = vld [vmem:[#allocation11_spill] sm:$0xff] }
 0x17e   :  { %v1670_v42 = vpop.eup %1669  ;;  %vm1207_vm6 = vcmp.eq.f32.partialorder %v2541_v63, inf  ;;  %vm1209_vm7 = vcmp.eq.f32.partialorder %v2541_v63, 0.0  ;;  %v1210_v15 = vand.u32 2147483648, %v2541_v63  ;;  %1677 = vrsqrt.f32 %v2603_v58 }
 0x17f   :  { %v984_v61 = vsel %vm983_vm4, %v2539_v45, %v982_v33  ;;  %v1206_v46 = vmul.f32 %v1670_v42, %v2541_v63  ;;  %vm990_vm8 = vcmp.eq.f32.partialorder %v2572_v7, inf  ;;  %1679 = vrsqrt.f32 %v2606_v3 }
 0x180   :  { %v987_v32 = vsel %vm985_vm5, %v986_v23, %v984_v61  ;;  %vm992_vm9 = vcmp.eq.f32.partialorder %v2572_v7, 0.0  ;;  %v993_v35 = vand.u32 2147483648, %v2572_v7  ;;  %v2624_v39 = vmax.f32 %v810_v13, 1e-12 }
 0x181   :  { %v1672_v2 = vpop.eup %1671  ;;  %1351 = vst [vmem:[#allocation8 + $0x68] sm:$0xff] %v987_v32  ;;  %v1208_v37 = vsel %vm1207_vm6, %v2541_v63, %v1206_v46  ;;  %v779_v14 = vsub.f32 %v3052_v22, %v715_v26  ;;  %v747_v16 = vmul.f32 2.0, %v2314_v55  ;;  %v716_v41 = vmul.f32 2.0, %v2329_v62  ;;  %v3053_v63 = vld [vmem:[#allocation30_spill] sm:$0xff] }
 0x182   :  { %v1674_v1 = vpop.eup %1673  ;;  %v1211_v45 = vsel %vm1209_vm7, %v1210_v15, %v1208_v37  ;;  %v989_v24 = vmul.f32 %v1672_v2, %v2572_v7  ;;  %vm1214_vm10 = vcmp.eq.f32.partialorder %v2574_v11, inf  ;;  %1681 = vrsqrt.f32 %v2624_v39 }
 0x183   :  { %1383 = vst [vmem:[#allocation8 + $0x168] sm:$0xff] %v1211_v45  ;;  %v1213_v51 = vmul.f32 %v1674_v1, %v2574_v11  ;;  %vm1216_vm11 = vcmp.eq.f32.partialorder %v2574_v11, 0.0  ;;  %v1217_v54 = vand.u32 2147483648, %v2574_v11  ;;  %v2638_v55 = vmax.f32 %v779_v14, 1e-12  ;;  %v3056_v1 = vld [vmem:[#allocation12_spill] sm:$0xff] }
 0x184   :  { %v991_v62 = vsel %vm990_vm8, %v2572_v7, %v989_v24  ;;  %v811_v59 = vsub.f32 %v3053_v63, %v747_v16  ;;  %v780_v8 = vsub.f32 %v3054_v10, %v716_v41  ;;  %v748_v21 = vmul.f32 2.0, %v2331_v34  ;;  %v3058_v63 = vld [vmem:[#allocation17_spill] sm:$0xff] }
 0x185   :  { %v1676_v50 = vpop.eup %1675  ;;  %v994_v47 = vsel %vm992_vm9, %v993_v35, %v991_v62  ;;  %v1215_v0 = vsel %vm1214_vm10, %v2574_v11, %v1213_v51  ;;  %vm997_vm12 = vcmp.eq.f32.partialorder %v2590_v57, inf  ;;  %1683 = vrsqrt.f32 %v2638_v55  ;;  %v3055_v11 = vld [vmem:[#allocation27_spill] sm:$0xff] }
 0x186   :  { %1352 = vst [vmem:[#allocation8 + $0x70] sm:$0xff] %v994_v47  ;;  %v1218_v23 = vsel %vm1216_vm11, %v1217_v54, %v1215_v0  ;;  %v996_v33 = vmul.f32 %v1676_v50, %v2590_v57  ;;  %vm999_vm13 = vcmp.eq.f32.partialorder %v2590_v57, 0.0  ;;  %v1000_v29 = vand.u32 2147483648, %v2590_v57  ;;  %v3057_v54 = vld [vmem:[#allocation28_spill] sm:$0xff]  ;;  %v3059_v0 = vld [vmem:[#allocation33_spill] sm:$0xff] }
 0x187   :  { %1384 = vst [vmem:[#allocation8 + $0x170] sm:$0xff] %v1218_v23  ;;  %vm1221_vm14 = vcmp.eq.f32.partialorder %v2603_v58, inf  ;;  %v2655_v34 = vmax.f32 %v811_v59, 1e-12  ;;  %v2657_v7 = vmax.f32 %v780_v8, 1e-12  ;;  %v812_v13 = vsub.f32 %v3055_v11, %v748_v21 }
 0x188   :  { %v1678_v26 = vpop.eup %1677  ;;  %v998_v42 = vsel %vm997_vm12, %v2590_v57, %v996_v33  ;;  %vm1223_vm15 = vcmp.eq.f32.partialorder %v2603_v58, 0.0  ;;  %v717_v15 = vmul.f32 2.0, %v2340_v18  ;;  %v749_v61 = vmul.f32 2.0, %v2342_v44 }
 0x189   :  { %v1680_v46 = vpop.eup %1679  ;;  %v1001_v32 = vsel %vm999_vm13, %v1000_v29, %v998_v42  ;;  %v1220_v35 = vmul.f32 %v1678_v26, %v2603_v58  ;;  %1685 = vrsqrt.f32 %v2655_v34  ;;  %v718_v2 = vmul.f32 2.0, %v2361_v56 }
 0x18a   :  { %1353 = vst [vmem:[#allocation8 + $0x78] sm:$0xff] %v1001_v32  ;;  %v1224_v37 = vand.u32 2147483648, %v2603_v58  ;;  %v1003_v22 = vmul.f32 %v1680_v46, %v2606_v3  ;;  %vm1004_vm0 = vcmp.eq.f32.partialorder %v2606_v3, inf  ;;  %1687 = vrsqrt.f32 %v2657_v7  ;;  %v3060_v46 = vld [vmem:[#allocation18_spill] sm:$0xff] }
 0x18b   :  { %v1222_v18 = vsel %vm1221_vm14, %v2603_v58, %v1220_v35  ;;  %vm1006_vm1 = vcmp.eq.f32.partialorder %v2606_v3, 0.0  ;;  %v1007_v44 = vand.u32 2147483648, %v2606_v3  ;;  %v750_v57 = vmul.f32 2.0, %v2363_v38 }
 0x18c   :  { %v1682_v56 = vpop.eup %1681  ;;  %v1225_v14 = vsel %vm1223_vm15, %v1224_v37, %v1222_v18  ;;  %v1005_v16 = vsel %vm1004_vm0, %v2606_v3, %v1003_v22  ;;  %v2680_v41 = vmax.f32 %v812_v13, 1e-12  ;;  %v781_v45 = vsub.f32 %v3056_v1, %v717_v15 }
 0x18d   :  { %1385 = vst [vmem:[#allocation8 + $0x178] sm:$0xff] %v1225_v14  ;;  %v1008_v24 = vsel %vm1006_vm1, %v1007_v44, %v1005_v16  ;;  %v1227_v51 = vmul.f32 %v1682_v56, %v2624_v39  ;;  %v813_v62 = vsub.f32 %v3057_v54, %v749_v61  ;;  %v782_v59 = vsub.f32 %v3058_v63, %v718_v2  ;;  %v3061_v56 = vld [vmem:[#allocation34_spill] sm:$0xff]  ;;  %v3062_v16 = vld [vmem:[#allocation15_spill] sm:$0xff] }
 0x18e   :  { %1354 = vst [vmem:[#allocation8 + $0x80] sm:$0xff] %v1008_v24  ;;  %vm1228_vm2 = vcmp.eq.f32.partialorder %v2624_v39, inf  ;;  %vm1230_vm3 = vcmp.eq.f32.partialorder %v2624_v39, 0.0  ;;  %v1231_v38 = vand.u32 2147483648, %v2624_v39  ;;  %1689 = vrsqrt.f32 %v2680_v41  ;;  %v3063_v54 = vld [vmem:[#allocation31_spill] sm:$0xff] }
 0x18f   :  { %v1684_v58 = vpop.eup %1683  ;;  %v1229_v3 = vsel %vm1228_vm2, %v2624_v39, %v1227_v51  ;;  %v2691_v10 = vmax.f32 %v781_v45, 1e-12  ;;  %v2693_v8 = vmax.f32 %v813_v62, 1e-12  ;;  %v2695_v21 = vmax.f32 %v782_v59, 1e-12 }
 0x190   :  { %v1232_v50 = vsel %vm1230_vm3, %v1231_v38, %v1229_v3  ;;  %v1010_v47 = vmul.f32 %v1684_v58, %v2638_v55  ;;  %vm1011_vm4 = vcmp.eq.f32.partialorder %v2638_v55, inf  ;;  %v814_v23 = vsub.f32 %v3059_v0, %v750_v57 }
 0x191   :  { %1386 = vst [vmem:[#allocation8 + $0x180] sm:$0xff] %v1232_v50  ;;  %vm1013_vm5 = vcmp.eq.f32.partialorder %v2638_v55, 0.0  ;;  %v1014_v33 = vand.u32 2147483648, %v2638_v55  ;;  %1691 = vrsqrt.f32 %v2691_v10  ;;  %v719_v39 = vmul.f32 2.0, %v2368_v60 }
 0x192   :  { %v1012_v29 = vsel %vm1011_vm4, %v2638_v55, %v1010_v47  ;;  %vm1235_vm6 = vcmp.eq.f32.partialorder %v2655_v34, inf  ;;  %vm1237_vm7 = vcmp.eq.f32.partialorder %v2655_v34, 0.0  ;;  %1693 = vrsqrt.f32 %v2693_v8 }
 0x193   :  { %v1686_v11 = vpop.eup %1685  ;;  %v1015_v13 = vsel %vm1013_vm5, %v1014_v33, %v1012_v29  ;;  %v1238_v26 = vand.u32 2147483648, %v2655_v34  ;;  %vm1018_vm8 = vcmp.eq.f32.partialorder %v2657_v7, inf  ;;  %1695 = vrsqrt.f32 %v2695_v21 }
 0x194   :  { %v1688_v42 = vpop.eup %1687  ;;  %1355 = vst [vmem:[#allocation8 + $0x88] sm:$0xff] %v1015_v13  ;;  %v1234_v60 = vmul.f32 %v1686_v11, %v2655_v34  ;;  %vm1020_vm9 = vcmp.eq.f32.partialorder %v2657_v7, 0.0  ;;  %v1021_v55 = vand.u32 2147483648, %v2657_v7  ;;  %v2714_v15 = vmax.f32 %v814_v23, 1e-12 }
 0x195   :  { %v1017_v61 = vmul.f32 %v1688_v42, %v2657_v7  ;;  %v783_v32 = vsub.f32 %v3060_v46, %v719_v39  ;;  %v751_v35 = vmul.f32 2.0, %v2370_v53  ;;  %v720_v2 = vmul.f32 2.0, %v2386_v36 }
 0x196   :  { %v1236_v37 = vsel %vm1235_vm6, %v2655_v34, %v1234_v60  ;;  %vm1242_vm10 = vcmp.eq.f32.partialorder %v2680_v41, inf  ;;  %vm1244_vm11 = vcmp.eq.f32.partialorder %v2680_v41, 0.0  ;;  %1697 = vrsqrt.f32 %v2714_v15  ;;  %v3064_v60 = vld [vmem:[#allocation16_spill] sm:$0xff] }
 0x197   :  { %v1239_v22 = vsel %vm1237_vm7, %v1238_v26, %v1236_v37  ;;  %v1019_v18 = vsel %vm1018_vm8, %v2657_v7, %v1017_v61  ;;  %v1245_v53 = vand.u32 2147483648, %v2680_v41  ;;  %v2732_v36 = vmax.f32 %v783_v32, 1e-12  ;;  %v3065_v61 = vld [vmem:[#allocation32_spill] sm:$0xff]  ;;  %v3066_v37 = vld [vmem:[#allocation21_spill] sm:$0xff] }
 0x198   :  { %v1690_v44 = vpop.eup %1689  ;;  %1387 = vst [vmem:[#allocation8 + $0x188] sm:$0xff] %v1239_v22  ;;  %v1022_v57 = vsel %vm1020_vm9, %v1021_v55, %v1019_v18  ;;  %v815_v14 = vsub.f32 %v3061_v56, %v751_v35  ;;  %v784_v1 = vsub.f32 %v3062_v16, %v720_v2  ;;  %v752_v34 = vmul.f32 2.0, %v2388_v27 }
 0x199   :  { %1356 = vst [vmem:[#allocation8 + $0x90] sm:$0xff] %v1022_v57  ;;  %v1241_v45 = vmul.f32 %v1690_v44, %v2680_v41  ;;  %vm1025_vm12 = vcmp.eq.f32.partialorder %v2691_v10, inf  ;;  %vm1027_vm13 = vcmp.eq.f32.partialorder %v2691_v10, 0.0  ;;  %1699 = vrsqrt.f32 %v2732_v36 }
 0x19a   :  { %v1028_v24 = vand.u32 2147483648, %v2691_v10  ;;  %v2744_v51 = vmax.f32 %v815_v14, 1e-12  ;;  %v2746_v7 = vmax.f32 %v784_v1, 1e-12  ;;  %v816_v62 = vsub.f32 %v3063_v54, %v752_v34  ;;  %v3068_v54 = vld [vmem:[#allocation22_spill] sm:$0xff] }
 0x19b   :  { %v1692_v63 = vpop.eup %1691  ;;  %v1243_v27 = vsel %vm1242_vm10, %v2680_v41, %v1241_v45  ;;  %vm1249_vm14 = vcmp.eq.f32.partialorder %v2693_v8, inf  ;;  %vm1251_vm15 = vcmp.eq.f32.partialorder %v2693_v8, 0.0  ;;  %v721_v59 = vmul.f32 2.0, %v2394_v48  ;;  %v3067_v45 = vld [vmem:[#allocation37_spill] sm:$0xff] }
 0x19c   :  { %v1694_v38 = vpop.eup %1693  ;;  %v1246_v58 = vsel %vm1244_vm11, %v1245_v53, %v1243_v27  ;;  %v1024_v3 = vmul.f32 %v1692_v63, %v2691_v10  ;;  %1701 = vrsqrt.f32 %v2744_v51  ;;  %v753_v50 = vmul.f32 2.0, %v2396_v30 }
 0x19d   :  { %v1696_v47 = vpop.eup %1695  ;;  %1388 = vst [vmem:[#allocation8 + $0x190] sm:$0xff] %v1246_v58  ;;  %v1248_v0 = vmul.f32 %v1694_v38, %v2693_v8  ;;  %v1252_v23 = vand.u32 2147483648, %v2693_v8  ;;  %vm1032_vm0 = vcmp.eq.f32.partialorder %v2695_v21, inf  ;;  %1703 = vrsqrt.f32 %v2746_v7 }
 0x19e   :  { %v1026_v48 = vsel %vm1025_vm12, %v2691_v10, %v1024_v3  ;;  %v1031_v41 = vmul.f32 %v1696_v47, %v2695_v21  ;;  %vm1034_vm1 = vcmp.eq.f32.partialorder %v2695_v21, 0.0  ;;  %v1035_v30 = vand.u32 2147483648, %v2695_v21 }
 0x19f   :  { %v1029_v33 = vsel %vm1027_vm13, %v1028_v24, %v1026_v48  ;;  %v1250_v39 = vsel %vm1249_vm14, %v2693_v8, %v1248_v0  ;;  %v2775_v29 = vmax.f32 %v816_v62, 1e-12  ;;  %v722_v11 = vmul.f32 2.0, %v2417_v9 }
 0x1a0   :  { %v1698_v13 = vpop.eup %1697  ;;  %1357 = vst [vmem:[#allocation8 + $0x98] sm:$0xff] %v1029_v33  ;;  %v1253_v26 = vsel %vm1251_vm15, %v1252_v23, %v1250_v39  ;;  %v1033_v42 = vsel %vm1032_vm0, %v2695_v21, %v1031_v41  ;;  %v785_v55 = vsub.f32 %v3064_v60, %v721_v59  ;;  %v817_v10 = vsub.f32 %v3065_v61, %v753_v50  ;;  %v3070_v41 = vld [vmem:[#allocation19_spill] sm:$0xff] }
 0x1a1   :  { %1389 = vst [vmem:[#allocation8 + $0x198] sm:$0xff] %v1253_v26  ;;  %v1036_v46 = vsel %vm1034_vm1, %v1035_v30, %v1033_v42  ;;  %v1255_v32 = vmul.f32 %v1698_v13, %v2714_v15  ;;  %vm1256_vm2 = vcmp.eq.f32.partialorder %v2714_v15, inf  ;;  %1705 = vrsqrt.f32 %v2775_v29 }
 0x1a2   :  { %1358 = vst [vmem:[#allocation8 + $0xa0] sm:$0xff] %v1036_v46  ;;  %vm1258_vm3 = vcmp.eq.f32.partialorder %v2714_v15, 0.0  ;;  %v1259_v9 = vand.u32 2147483648, %v2714_v15  ;;  %v2788_v8 = vmax.f32 %v785_v55, 1e-12  ;;  %v786_v22 = vsub.f32 %v3066_v37, %v722_v11 }
 0x1a3   :  { %v2790_v21 = vmax.f32 %v817_v10, 1e-12  ;;  %v1700_v35 = vpop.eup %1699  ;;  %v1257_v2 = vsel %vm1256_vm2, %v2714_v15, %v1255_v32  ;;  %v754_v18 = vmul.f32 2.0, %v2419_v31  ;;  %v723_v53 = vmul.f32 2.0, %v2426_v5  ;;  %v3071_v32 = vld [vmem:[#allocation35_spill] sm:$0xff] }
 0x1a4   :  { %v1260_v44 = vsel %vm1258_vm3, %v1259_v9, %v1257_v2  ;;  %v1038_v57 = vmul.f32 %v1700_v35, %v2732_v36  ;;  %vm1039_vm4 = vcmp.eq.f32.partialorder %v2732_v36, inf  ;;  %1707 = vrsqrt.f32 %v2788_v8 }
 0x1a5   :  { %1390 = vst [vmem:[#allocation8 + $0x1a0] sm:$0xff] %v1260_v44  ;;  %vm1041_vm5 = vcmp.eq.f32.partialorder %v2732_v36, 0.0  ;;  %v1042_v56 = vand.u32 2147483648, %v2732_v36  ;;  %vm1263_vm6 = vcmp.eq.f32.partialorder %v2744_v51, inf  ;;  %1709 = vrsqrt.f32 %v2790_v21 }
 0x1a6   :  { %v1702_v15 = vpop.eup %1701  ;;  %v1040_v31 = vsel %vm1039_vm4, %v2732_v36, %v1038_v57  ;;  %vm1265_vm7 = vcmp.eq.f32.partialorder %v2744_v51, 0.0  ;;  %v1266_v5 = vand.u32 2147483648, %v2744_v51  ;;  %v2806_v14 = vmax.f32 %v786_v22, 1e-12 }
 0x1a7   :  { %v1704_v16 = vpop.eup %1703  ;;  %v1043_v1 = vsel %vm1041_vm5, %v1042_v56, %v1040_v31  ;;  %v1262_v34 = vmul.f32 %v1702_v15, %v2744_v51  ;;  %v818_v24 = vsub.f32 %v3067_v45, %v754_v18  ;;  %v787_v62 = vsub.f32 %v3068_v54, %v723_v53  ;;  %v3074_v45 = vld [vmem:[#allocation42_spill] sm:$0xff] }
 0x1a8   :  { %1359 = vst [vmem:[#allocation8 + $0xa8] sm:$0xff] %v1043_v1  ;;  %v1045_v63 = vmul.f32 %v1704_v16, %v2746_v7  ;;  %vm1046_vm8 = vcmp.eq.f32.partialorder %v2746_v7, inf  ;;  %vm1048_vm9 = vcmp.eq.f32.partialorder %v2746_v7, 0.0  ;;  %1711 = vrsqrt.f32 %v2806_v14 }
 0x1a9   :  { %v1264_v36 = vsel %vm1263_vm6, %v2744_v51, %v1262_v34  ;;  %v1049_v27 = vand.u32 2147483648, %v2746_v7  ;;  %v2819_v59 = vmax.f32 %v818_v24, 1e-12  ;;  %v2821_v38 = vmax.f32 %v787_v62, 1e-12 }
 0x1aa   :  { %v1267_v58 = vsel %vm1265_vm7, %v1266_v5, %v1264_v36  ;;  %v1047_v3 = vsel %vm1046_vm8, %v2746_v7, %v1045_v63  ;;  %v755_v50 = vmul.f32 2.0, %v2428_v43  ;;  %v724_v47 = vmul.f32 2.0, %v2451_v6  ;;  %v3069_v6 = vld [vmem:[#allocation38_spill] sm:$0xff] }
 0x1ab   :  { %v1706_v0 = vpop.eup %1705  ;;  %1391 = vst [vmem:[#allocation8 + $0x1a8] sm:$0xff] %v1267_v58  ;;  %v1050_v23 = vsel %vm1048_vm9, %v1049_v27, %v1047_v3  ;;  %vm1270_vm10 = vcmp.eq.f32.partialorder %v2775_v29, inf  ;;  %vm1272_vm11 = vcmp.eq.f32.partialorder %v2775_v29, 0.0  ;;  %1713 = vrsqrt.f32 %v2819_v59 }
 0x1ac   :  { %1360 = vst [vmem:[#allocation8 + $0xb0] sm:$0xff] %v1050_v23  ;;  %v1269_v48 = vmul.f32 %v1706_v0, %v2775_v29  ;;  %v1273_v51 = vand.u32 2147483648, %v2775_v29  ;;  %vm1053_vm12 = vcmp.eq.f32.partialorder %v2788_v8, inf  ;;  %1715 = vrsqrt.f32 %v2821_v38 }
 0x1ad   :  { %vm1055_vm13 = vcmp.eq.f32.partialorder %v2788_v8, 0.0  ;;  %v1056_v43 = vand.u32 2147483648, %v2788_v8  ;;  %v819_v7 = vsub.f32 %v3069_v6, %v755_v50  ;;  %v788_v30 = vsub.f32 %v3070_v41, %v724_v47  ;;  %v3076_v47 = vld [vmem:[#allocation25_spill] sm:$0xff] }
 0x1ae   :  { %v1708_v33 = vpop.eup %1707  ;;  %v1271_v39 = vsel %vm1270_vm10, %v2775_v29, %v1269_v48  ;;  %v756_v11 = vmul.f32 2.0, %v2453_v17  ;;  %v725_v13 = vmul.f32 2.0, %v2459_v20  ;;  %v757_v26 = vmul.f32 2.0, %v2461_v25  ;;  %v3072_v17 = vld [vmem:[#allocation20_spill] sm:$0xff] }
 0x1af   :  { %v1710_v42 = vpop.eup %1709  ;;  %v1274_v60 = vsel %vm1272_vm11, %v1273_v51, %v1271_v39  ;;  %v1052_v55 = vmul.f32 %v1708_v33, %v2788_v8  ;;  %v2846_v61 = vmax.f32 %v819_v7, 1e-12  ;;  %v2848_v10 = vmax.f32 %v788_v30, 1e-12  ;;  %v3073_v20 = vld [vmem:[#allocation36_spill] sm:$0xff]  ;;  %v3078_v51 = vld [vmem:[#allocation26_spill] sm:$0xff] }
 0x1b0   :  { %1392 = vst [vmem:[#allocation8 + $0x1b0] sm:$0xff] %v1274_v60  ;;  %v1276_v46 = vmul.f32 %v1710_v42, %v2790_v21  ;;  %v820_v9 = vsub.f32 %v3071_v32, %v756_v11  ;;  %v789_v35 = vsub.f32 %v3072_v17, %v725_v13  ;;  %v821_v2 = vsub.f32 %v3073_v20, %v757_v26  ;;  %v3079_v17 = vld [vmem:[#allocation23_spill] sm:$0xff] }
 0x1b1   :  { %v1054_v25 = vsel %vm1053_vm12, %v2788_v8, %v1052_v55  ;;  %vm1277_vm14 = vcmp.eq.f32.partialorder %v2790_v21, inf  ;;  %v1280_v29 = vand.u32 2147483648, %v2790_v21  ;;  %1717 = vrsqrt.f32 %v2846_v61 }
 0x1b2   :  { %v1712_v37 = vpop.eup %1711  ;;  %v1057_v22 = vsel %vm1055_vm13, %v1056_v43, %v1054_v25  ;;  %v1278_v18 = vsel %vm1277_vm14, %v2790_v21, %v1276_v46  ;;  %vm1279_vm15 = vcmp.eq.f32.partialorder %v2790_v21, 0.0  ;;  %1719 = vrsqrt.f32 %v2848_v10  ;;  %v3080_v25 = vld [vmem:[#allocation39_spill] sm:$0xff] }
 0x1b3   :  { %1361 = vst [vmem:[#allocation8 + $0xb8] sm:$0xff] %v1057_v22  ;;  %v1281_v53 = vsel %vm1279_vm15, %v1280_v29, %v1278_v18  ;;  %v1059_v44 = vmul.f32 %v1712_v37, %v2806_v14  ;;  %vm1060_vm0 = vcmp.eq.f32.partialorder %v2806_v14, inf  ;;  %vm1062_vm1 = vcmp.eq.f32.partialorder %v2806_v14, 0.0  ;;  %v3081_v37 = vld [vmem:[#allocation24_spill] sm:$0xff] }
 0x1b4   :  { %1393 = vst [vmem:[#allocation8 + $0x1b8] sm:$0xff] %v1281_v53  ;;  %v1063_v57 = vand.u32 2147483648, %v2806_v14  ;;  %vm1284_vm2 = vcmp.eq.f32.partialorder %v2819_v59, inf  ;;  %v2870_v8 = vmax.f32 %v820_v9, 1e-12  ;;  %vm1286_vm3 = vcmp.eq.f32.partialorder %v2819_v59, 0.0 }
 0x1b5   :  { %v2872_v56 = vmax.f32 %v789_v35, 1e-12  ;;  %v1714_v21 = vpop.eup %1713  ;;  %v1061_v15 = vsel %vm1060_vm0, %v2806_v14, %v1059_v44  ;;  %v1287_v31 = vand.u32 2147483648, %v2819_v59  ;;  %v2877_v5 = vmax.f32 %v821_v2, 1e-12  ;;  %v3075_v14 = vld [vmem:[#allocation43_spill] sm:$0xff] }
 0x1b6   :  { %v1716_v16 = vpop.eup %1715  ;;  %v1064_v1 = vsel %vm1062_vm1, %v1063_v57, %v1061_v15  ;;  %v1283_v34 = vmul.f32 %v1714_v21, %v2819_v59  ;;  %1721 = vrsqrt.f32 %v2870_v8  ;;  %v726_v24 = vmul.f32 2.0, %v3074_v45 }
 0x1b7   :  { %1362 = vst [vmem:[#allocation8 + $0xc0] sm:$0xff] %v1064_v1  ;;  %v1066_v54 = vmul.f32 %v1716_v16, %v2821_v38  ;;  %1723 = vrsqrt.f32 %v2872_v56  ;;  %v758_v62 = vmul.f32 2.0, %v3075_v14  ;;  %v727_v63 = vmul.f32 2.0, %v2480_v12 }
 0x1b8   :  { %v1285_v36 = vsel %vm1284_vm2, %v2819_v59, %v1283_v34  ;;  %vm1067_vm4 = vcmp.eq.f32.partialorder %v2821_v38, inf  ;;  %vm1069_vm5 = vcmp.eq.f32.partialorder %v2821_v38, 0.0  ;;  %v1070_v27 = vand.u32 2147483648, %v2821_v38  ;;  %v3077_v59 = vld [vmem:[#allocation41_spill] sm:$0xff]  ;;  %v3082_v34 = vld [vmem:[#allocation40_spill] sm:$0xff] }
 0x1b9   :  { %v1288_v58 = vsel %vm1286_vm3, %v1287_v31, %v1285_v36  ;;  %v1068_v3 = vsel %vm1067_vm4, %v2821_v38, %v1066_v54  ;;  %vm1291_vm6 = vcmp.eq.f32.partialorder %v2846_v61, inf  ;;  %1725 = vrsqrt.f32 %v2877_v5 }
 0x1ba   :  { %1394 = vst [vmem:[#allocation8 + $0x1c0] sm:$0xff] %v1288_v58  ;;  %v1071_v12 = vsel %vm1069_vm5, %v1070_v27, %v1068_v3  ;;  %vm1293_vm7 = vcmp.eq.f32.partialorder %v2846_v61, 0.0  ;;  %v1294_v50 = vand.u32 2147483648, %v2846_v61  ;;  %v790_v0 = vsub.f32 %v3076_v47, %v726_v24 }
 0x1bb   :  { %v1718_v23 = vpop.eup %1717  ;;  %1363 = vst [vmem:[#allocation8 + $0xc8] sm:$0xff] %v1071_v12  ;;  %vm1074_vm8 = vcmp.eq.f32.partialorder %v2848_v10, inf  ;;  %v822_v48 = vsub.f32 %v3077_v59, %v758_v62  ;;  %v791_v38 = vsub.f32 %v3078_v51, %v727_v63  ;;  %v759_v43 = vmul.f32 2.0, %v2482_v52 }
 0x1bc   :  { %v1720_v6 = vpop.eup %1719  ;;  %v1290_v7 = vmul.f32 %v1718_v23, %v2846_v61  ;;  %vm1076_vm9 = vcmp.eq.f32.partialorder %v2848_v10, 0.0  ;;  %v1077_v41 = vand.u32 2147483648, %v2848_v10  ;;  %v2907_v30 = vmax.f32 %v790_v0, 1e-12 }
 0x1bd   :  { %v1073_v33 = vmul.f32 %v1720_v6, %v2848_v10  ;;  %v2910_v39 = vmax.f32 %v822_v48, 1e-12  ;;  %v2912_v11 = vmax.f32 %v791_v38, 1e-12  ;;  %v823_v13 = vsub.f32 %v2559_v49, %v759_v43 }
 0x1be   :  { %v1292_v52 = vsel %vm1291_vm6, %v2846_v61, %v1290_v7  ;;  %1727 = vrsqrt.f32 %v2907_v30  ;;  %v728_v26 = vmul.f32 2.0, %v2502_v28  ;;  %v760_v42 = vmul.f32 2.0, %v2504_v19 }
 0x1bf   :  { %v1295_v60 = vsel %vm1293_vm7, %v1294_v50, %v1292_v52  ;;  %v1075_v55 = vsel %vm1074_vm8, %v2848_v10, %v1073_v33  ;;  %1729 = vrsqrt.f32 %v2910_v39  ;;  %v729_v49 = vmul.f32 2.0, %v2512_v40 }
 0x1c0   :  { %v1722_v46 = vpop.eup %1721  ;;  %1395 = vst [vmem:[#allocation8 + $0x1c8] sm:$0xff] %v1295_v60  ;;  %v1078_v32 = vsel %vm1076_vm9, %v1077_v41, %v1075_v55  ;;  %vm1298_vm10 = vcmp.eq.f32.partialorder %v2870_v8, inf  ;;  %vm1300_vm11 = vcmp.eq.f32.partialorder %v2870_v8, 0.0  ;;  %v1301_v28 = vand.u32 2147483648, %v2870_v8 }
 0x1c1   :  { %v1724_v19 = vpop.eup %1723  ;;  %1364 = vst [vmem:[#allocation8 + $0xd0] sm:$0xff] %v1078_v32  ;;  %v1297_v61 = vmul.f32 %v1722_v46, %v2870_v8  ;;  %vm1081_vm12 = vcmp.eq.f32.partialorder %v2872_v56, inf  ;;  %vm1083_vm13 = vcmp.eq.f32.partialorder %v2872_v56, 0.0  ;;  %1731 = vrsqrt.f32 %v2912_v11 }
 0x1c2   :  { %v1080_v40 = vmul.f32 %v1724_v19, %v2872_v56  ;;  %v1084_v10 = vand.u32 2147483648, %v2872_v56  ;;  %v2939_v9 = vmax.f32 %v823_v13, 1e-12  ;;  %v792_v35 = vsub.f32 %v3079_v17, %v728_v26 }
 0x1c3   :  { %v1726_v20 = vpop.eup %1725  ;;  %v1299_v2 = vsel %vm1298_vm10, %v2870_v8, %v1297_v61  ;;  %v824_v29 = vsub.f32 %v3080_v25, %v760_v42  ;;  %v793_v22 = vsub.f32 %v3081_v37, %v729_v49  ;;  %v761_v18 = vmul.f32 2.0, %v2514_v4 }
 0x1c4   :  { %v1302_v53 = vsel %vm1300_vm11, %v1301_v28, %v1299_v2  ;;  %v1082_v44 = vsel %vm1081_vm12, %v2872_v56, %v1080_v40  ;;  %v1304_v57 = vmul.f32 %v1726_v20, %v2877_v5  ;;  %1733 = vrsqrt.f32 %v2939_v9 }
 0x1c5   :  { %1396 = vst [vmem:[#allocation8 + $0x1d0] sm:$0xff] %v1302_v53  ;;  %v1085_v21 = vsel %vm1083_vm13, %v1084_v10, %v1082_v44  ;;  %vm1305_vm14 = vcmp.eq.f32.partialorder %v2877_v5, inf  ;;  %vm1307_vm15 = vcmp.eq.f32.partialorder %v2877_v5, 0.0  ;;  %v1308_v15 = vand.u32 2147483648, %v2877_v5 }
 0x1c6   :  { %1365 = vst [vmem:[#allocation8 + $0xd8] sm:$0xff] %v1085_v21  ;;  %v1306_v4 = vsel %vm1305_vm14, %v2877_v5, %v1304_v57  ;;  %v856_v8 = vmax.f32 %v792_v35, 1e-12  ;;  %v2957_v31 = vmax.f32 %v824_v29, 1e-12  ;;  %v825_v45 = vsub.f32 %v3082_v34, %v761_v18 }
 0x1c7   :  { %v2959_v16 = vmax.f32 %v793_v22, 1e-12  ;;  %v1309_v1 = vsel %vm1307_vm15, %v1308_v15, %v1306_v4  ;;  %vm1088_vm0 = vcmp.eq.f32.partialorder %v2907_v30, inf  ;;  %vm1090_vm1 = vcmp.eq.f32.partialorder %v2907_v30, 0.0 }
 0x1c8   :  { %v1728_v24 = vpop.eup %1727  ;;  %1397 = vst [vmem:[#allocation8 + $0x1d8] sm:$0xff] %v1309_v1  ;;  %1735 = vrsqrt.f32 %v856_v8  ;;  %v1091_v5 = vand.u32 2147483648, %v2907_v30  ;;  %vm1312_vm2 = vcmp.eq.f32.partialorder %v2910_v39, inf  ;;  %v1315_v36 = vand.u32 2147483648, %v2910_v39 }
 0x1c9   :  { %v1730_v56 = vpop.eup %1729  ;;  %v1087_v54 = vmul.f32 %v1728_v24, %v2907_v30  ;;  %1737 = vrsqrt.f32 %v2957_v31  ;;  %v889_v27 = vmax.f32 %v825_v45, 1e-12  ;;  %vm1314_vm3 = vcmp.eq.f32.partialorder %v2910_v39, 0.0 }
 0x1ca   :  { %v1311_v14 = vmul.f32 %v1730_v56, %v2910_v39  ;;  %1739 = vrsqrt.f32 %v2959_v16  ;;  %vm1095_vm4 = vcmp.eq.f32.partialorder %v2912_v11, inf  ;;  %v1098_v47 = vand.u32 2147483648, %v2912_v11 }
 0x1cb   :  { %v1732_v62 = vpop.eup %1731  ;;  %v1089_v63 = vsel %vm1088_vm0, %v2907_v30, %v1087_v54  ;;  %1741 = vrsqrt.f32 %v889_v27  ;;  %vm1097_vm5 = vcmp.eq.f32.partialorder %v2912_v11, 0.0  ;;  %vm1319_vm6 = vcmp.eq.f32.partialorder %v2939_v9, inf }
 0x1cc   :  { %v1092_v58 = vsel %vm1090_vm1, %v1091_v5, %v1089_v63  ;;  %v1313_v3 = vsel %vm1312_vm2, %v2910_v39, %v1311_v14  ;;  %v1094_v12 = vmul.f32 %v1732_v62, %v2912_v11  ;;  %v1322_v51 = vand.u32 2147483648, %v2939_v9 }
 0x1cd   :  { %1366 = vst [vmem:[#allocation8 + $0xe0] sm:$0xff] %v1092_v58  ;;  %v1316_v50 = vsel %vm1314_vm3, %v1315_v36, %v1313_v3  ;;  %vm1321_vm7 = vcmp.eq.f32.partialorder %v2939_v9, 0.0  ;;  %vm1102_vm8 = vcmp.eq.f32.partialorder %v856_v8, inf  ;;  %vm1104_vm9 = vcmp.eq.f32.partialorder %v856_v8, 0.0 }
 0x1ce   :  { %v1734_v0 = vpop.eup %1733  ;;  %1398 = vst [vmem:[#allocation8 + $0x1e0] sm:$0xff] %v1316_v50  ;;  %v1096_v23 = vsel %vm1095_vm4, %v2912_v11, %v1094_v12  ;;  %v1105_v33 = vand.u32 2147483648, %v856_v8  ;;  %vm1326_vm10 = vcmp.eq.f32.partialorder %v2957_v31, inf  ;;  %vm1328_vm11 = vcmp.eq.f32.partialorder %v2957_v31, 0.0 }
 0x1cf   :  { %v1099_v59 = vsel %vm1097_vm5, %v1098_v47, %v1096_v23  ;;  %v1318_v48 = vmul.f32 %v1734_v0, %v2939_v9  ;;  %v1329_v13 = vand.u32 2147483648, %v2957_v31  ;;  %vm1109_vm12 = vcmp.eq.f32.partialorder %v2959_v16, inf }
 0x1d0   :  { %1367 = vst [vmem:[#allocation8 + $0xe8] sm:$0xff] %v1099_v59  ;;  %v1112_v60 = vand.u32 2147483648, %v2959_v16  ;;  %vm1111_vm13 = vcmp.eq.f32.partialorder %v2959_v16, 0.0  ;;  %vm1333_vm14 = vcmp.eq.f32.partialorder %v889_v27, inf  ;;  %v1336_v19 = vand.u32 2147483648, %v889_v27 }
 0x1d1   :  { %v1320_v38 = vsel %vm1319_vm6, %v2939_v9, %v1318_v48  ;;  %vm1335_vm15 = vcmp.eq.f32.partialorder %v889_v27, 0.0 }
 0x1d2   :  { %v1736_v43 = vpop.eup %1735  ;;  %v1323_v6 = vsel %vm1321_vm7, %v1322_v51, %v1320_v38 }
 0x1d3   :  { %v1738_v7 = vpop.eup %1737  ;;  %1399 = vst [vmem:[#allocation8 + $0x1e8] sm:$0xff] %v1323_v6  ;;  %v1101_v41 = vmul.f32 %v1736_v43, %v856_v8 }
 0x1d4   :  { %v1740_v30 = vpop.eup %1739  ;;  %v1325_v39 = vmul.f32 %v1738_v7, %v2957_v31 }
 0x1d5   :  { %v1103_v11 = vsel %vm1102_vm8, %v856_v8, %v1101_v41  ;;  %v1108_v52 = vmul.f32 %v1740_v30, %v2959_v16  ;;  %v1742_v55 = vpop.eup %1741 }
 0x1d6   :  { %v1106_v26 = vsel %vm1104_vm9, %v1105_v33, %v1103_v11  ;;  %v1327_v42 = vsel %vm1326_vm10, %v2957_v31, %v1325_v39  ;;  %v1332_v28 = vmul.f32 %v1742_v55, %v889_v27 }
 0x1d7   :  { %1368 = vst [vmem:[#allocation8 + $0xf0] sm:$0xff] %v1106_v26  ;;  %v1330_v49 = vsel %vm1328_vm11, %v1329_v13, %v1327_v42  ;;  %v1110_v46 = vsel %vm1109_vm12, %v2959_v16, %v1108_v52 }
 0x1d8   :  { %1400 = vst [vmem:[#allocation8 + $0x1f0] sm:$0xff] %v1330_v49  ;;  %v1113_v32 = vsel %vm1111_vm13, %v1112_v60, %v1110_v46  ;;  %v1334_v61 = vsel %vm1333_vm14, %v889_v27, %v1332_v28 }
 0x1d9   :  { %1369 = vst [vmem:[#allocation8 + $0xf8] sm:$0xff] %v1113_v32  ;;  %v1337_v40 = vsel %vm1335_vm15, %v1336_v19, %v1334_v61 }
 0x1da   :  { %1401 = vst [vmem:[#allocation8 + $0x1f8] sm:$0xff] %v1337_v40 }
 0x1db   :  { %1778 = shalt.err (!%p1775_p4)
}
 0x1dc   :  { %s1779_s12 = scalar_lea.hbm %s1414_s10, 8192  ;;  %s1781_s3 = scalar_lea.hbm %s3016_s6, 8192 }
 0x1dd   :  { %p1780_p5 = scmp.ne.s32.totalorder %s1414_s10, %s1779_s12  ;;  %p1782_p6 = scmp.lt.u32.totalorder %s1414_s10, %s3016_s6 }
 0x1de   :  { %p1783_p7 = scmp.lt.u32.totalorder %s1781_s3, %s1779_s12  ;;  %p1785_p9 = scmp.lt.u32.totalorder %s1779_s12, %s1414_s10 }
 0x1e0   :  { %p1784_p8 = por %p1783_p7, %p1782_p6 }
 0x1e2   :  { %p1786_p10 = por %p1785_p9, %p1784_p8 }
 0x1e4   :  { %p1787_p11 = pnand %p1786_p10, %p1780_p5 }
 0x1e6   :  { %1790 = shalt.err (!%p1787_p11)
}
 0x1e7   :  { %s1800_s17 = smov 256   ;;  %s1801_s18 = smov 16  }
 0x1e8   :  { %1421 = dma.vmem_to_hbm [thread:$0]  %s1416_s7, 8192, %s1414_s10, [#allocation7], %s1800_s17, %s1800_s17, %s1801_s18  }
 0x1e9   :  { %1793 = dma.done.wait [#allocation7], 8192  }
 0x1ea   :  { %1794 = vsyncadd [#allocation7], 4294959104 }
 0x1eb   :  { %1425 = vsyncpa [#allocation6], 1 }
 0x1ec   :  { %1426 = vsyncpa [#allocation7], 1 }

</bundles_post_ra>
